<compile_context>
chip_gen: v6e
topology: v6e:2x2x1
jax: 0.10.0
libtpu: 0.0.40
codegen_flags: <defaults>
</compile_context>

<pallas_src>
import functools

import jax
import jax.numpy as jnp
import numpy as np
from jax.experimental import pallas as pl
from jax.experimental.pallas import tpu as pltpu

EPS = 1e-5  # PyTorch InstanceNorm2d default


def _round_up(a, b):
    return ((a + b - 1) // b) * b


# --------------------------------------------------------------------------
# Pallas kernel: one (stacked) batch group per grid step; everything in VMEM.
# --------------------------------------------------------------------------
def _resblock_kernel(x_ref, mask_ref, w1_ref, b1_ref, w2_ref, b2_ref, pool_ref,
                     out_ref, pad_ref, *patch_scratch,
                     H, W, OFF, G, use_im2col):
    # x_ref   : (1, CeI, Hp)        activations, row-padded layout, CeI=Nb*Cin
    # mask_ref: (1, Hp)             1.0 on the H*W valid pixels, 0.0 on pads
    # w1_ref  : direct (9, CeI, CeI)   | im2col (CeI, 9*CeI)     block-diag
    # b1_ref  : (CeI, 1)
    # w2_ref  : direct (10, CeO, CeI)  | im2col (CeO, 10*CeI)    tap 9 = 1x1 id
    # b2_ref  : (CeO, 1)            b2 + b3 (biases commute with avg-pool)
    # pool_ref: (2*G*Wp, G*Wo)      block-diagonal grouped 2x2 avg-pool matrix
    # out_ref : (1, CeO, Ho*Wo)
    # pad_ref : scratch (CeI, OFF + Hp + OFF)   flat halo-padded image
    # patch_scratch: (10*CeI, Hp) im2col scratch, only when use_im2col
    f32 = jnp.float32
    Wp = W + 2
    Hp = H * Wp
    Ho, Wo = H // 2, W // 2
    Ce_in = pad_ref.shape[0]
    inv_hw = 1.0 / float(H * W)
    n_pad = float(2 * H)            # zero pad positions per (b, c) row

    patch_ref = patch_scratch[0] if use_im2col else None

    # Only the halo borders need to be zero; the interior is fully rewritten
    # by every staging store.  Re-zeroing per step keeps this megacore-safe.
    pad_ref[:, 0:OFF] = jnp.zeros((Ce_in, OFF), f32)
    pad_ref[:, OFF + Hp:OFF + Hp + OFF] = jnp.zeros((Ce_in, OFF), f32)

    mask = mask_ref[...]            # (1, Hp), broadcast over channels
    x = x_ref[0]                    # (CeI, Hp), pad columns are already zero

    def inst_norm_relu(am):
        # `am` must have zero pad columns.  Stats are exact over the H*W
        # valid pixels: corrected two-pass variance (the 2*H pad positions
        # contribute exactly mean^2 each to sum((am-mean)^2)).
        mean = jnp.sum(am, axis=1, keepdims=True) * inv_hw
        d = am - mean
        var = (jnp.sum(d * d, axis=1, keepdims=True)
               - n_pad * mean * mean) * inv_hw
        s = jax.lax.rsqrt(jnp.maximum(var, 0.0) + EPS)
        return jnp.maximum(d * s, 0.0)

    def tap_window(t):
        dy, dx = t // 3 - 1, t % 3 - 1
        start = OFF + dy * Wp + dx
        return pad_ref[:, start:start + Hp]

    def conv3x3(src, w_ref, b_ref, n_taps, extra_src=None):
        # src: (CeI, Hp) with ZERO pad columns.  SAME 3x3 conv in the
        # row-padded layout: horizontal padding comes from the zero pad
        # columns in the data, vertical padding from the zeroed halo borders,
        # so no masks/selects are needed on the tap windows.
        pad_ref[:, OFF:OFF + Hp] = src          # 128-lane-aligned staging
        if use_im2col:
            for t in range(9):
                patch_ref[t * Ce_in:(t + 1) * Ce_in, :] = tap_window(t)
            if n_taps == 10:                    # identity 1x1 as 10th tap
                patch_ref[9 * Ce_in:10 * Ce_in, :] = extra_src
            acc = jnp.dot(w_ref[...], patch_ref[0:n_taps * Ce_in, :],
                          preferred_element_type=f32)
        else:
            # direct accumulation: MXU has huge slack at small Cin, and this
            # removes all patch stores + the patch scratch entirely.
            acc = jnp.dot(w_ref[0], tap_window(0), preferred_element_type=f32)
            for t in range(1, 9):
                acc = acc + jnp.dot(w_ref[t], tap_window(t),
                                    preferred_element_type=f32)
            if n_taps == 10:
                acc = acc + jnp.dot(w_ref[9], extra_src,
                                    preferred_element_type=f32)
        return acc + b_ref[...]

    # ---- main branch (identity 1x1 folded into conv2 as tap 9) ----
    h = inst_norm_relu(x) * mask                     # zero pads -> conv input
    y1 = conv3x3(h, w1_ref, b1_ref, 9)               # Conv3x3 Cin -> Cin
    h = inst_norm_relu(y1 * mask) * mask             # mask: stats + conv input
    y2 = conv3x3(h, w2_ref, b2_ref, 10, extra_src=x)  # Conv3x3 + 1x1 identity

    # ---- grouped 2x2 average pooling: one MXU dot per band of G output rows,
    #      lane-dense store of width G*Wo (Ho//G is 1 or small). ----
    band = 2 * G * Wp
    for g in range(Ho // G):
        res = jnp.dot(y2[:, g * band:(g + 1) * band], pool_ref[...],
                      preferred_element_type=f32)
        out_ref[0, :, g * G * Wo:(g + 1) * G * Wo] = res.astype(out_ref.dtype)


# --------------------------------------------------------------------------
# Host-side helpers (structural constants, built with numpy -- shapes only)
# --------------------------------------------------------------------------
def _valid_mask(H, W):
    Wp = W + 2
    m = np.zeros((1, H * Wp), np.float32)
    m.reshape(H, Wp)[:, 1:W + 1] = 1.0
    return jnp.asarray(m)


def _pool_matrix(W, G):
    """(2*G*Wp, G*Wo) block-diagonal matrix: 2x2 avg-pools G row-pairs of the
    row-padded (width W+2) layout; pad columns map to zero rows."""
    Wp, Wo = W + 2, W // 2
    p = np.zeros((2 * G * Wp, G * Wo), np.float32)
    for g in range(G):
        base = 2 * g * Wp
        for wo in range(Wo):
            col = g * Wo + wo
            for dr in (0, 1):
                for dc in (1, 2):
                    p[base + dr * Wp + dc + 2 * wo, col] = 0.25
    return jnp.asarray(p)


# --------------------------------------------------------------------------
# Host-side glue
# --------------------------------------------------------------------------
@jax.jit
def resblock_forward(x_nchw, w1, b1, w2, b2, w3, b3):
    """x_nchw: (N, Cin, H, W).  Conv weights in HWIO: w1 (3,3,Cin,Cin),
    w2 (3,3,Cin,Cout); w3 (Cin,Cout) is the 1x1 identity conv.
    Returns NCHW (N, Cout, H//2, W//2)."""
    N, Cin, H, W = x_nchw.shape
    Cout = w2.shape[-1]
    assert H % 2 == 0 and W % 2 == 0, "AvgPool2d(2) path assumes even H, W"
    Ho, Wo = H // 2, W // 2
    Wp = W + 2
    Hp = H * Wp
    OFF = _round_up(Wp + 1, 128)        # lane-aligned halo offset

    # batch stacking so the stacked channel count fills the 8 vreg sublanes
    Nb = min(N, max(1, 8 // Cin)) if Cin < 8 else 1
    while N % Nb != 0:
        Nb -= 1
    CeI, CeO = Nb * Cin, Nb * Cout

    # im2col single-dot conv only pays off at larger channel counts
    use_im2col = CeI >= 32

    # pooling group: G output rows per pool matmul, G | Ho, aim for >=128 lanes
    G = Ho
    for g in range(1, Ho + 1):
        if Ho % g == 0 and g * Wo >= 128:
            G = g
            break

    f32 = jnp.float32
    # Row-padded activations: pad W by 1 zero column each side, then flatten.
    # NCHW -> (N//Nb, Nb*Cin, H*(W+2)) is a free host-side reshape.
    x_pad = jnp.pad(x_nchw.astype(f32), ((0, 0), (0, 0), (0, 0), (1, 1)))
    x_stacked = x_pad.reshape(N // Nb, CeI, Hp)

    # Block-diagonal per-tap weights for the stacked batch layout.
    eye = jnp.eye(Nb, dtype=f32)

    def block_diag_taps(w_hwio):        # (3,3,I,O) -> (9, Nb*O, Nb*I)
        kh, kw, I, O = w_hwio.shape
        m = jnp.transpose(w_hwio.astype(f32).reshape(kh * kw, I, O), (0, 2, 1))
        return jnp.einsum('ab,toi->taobi', eye, m).reshape(kh * kw, Nb * O,
                                                           Nb * I)

    w1_taps = block_diag_taps(w1)                                   # (9,CeI,CeI)
    w2_taps = block_diag_taps(w2)                                   # (9,CeO,CeI)
    w3_bd = jnp.einsum('ab,oi->aobi', eye,
                       w3.T.astype(f32)).reshape(1, CeO, CeI)       # identity tap
    w2_taps = jnp.concatenate([w2_taps, w3_bd], axis=0)             # (10,CeO,CeI)

    b1_bd = jnp.tile(b1.astype(f32), Nb).reshape(CeI, 1)
    b23_bd = jnp.tile((b2 + b3).astype(f32), Nb).reshape(CeO, 1)

    if use_im2col:
        w1_arg = jnp.transpose(w1_taps, (1, 0, 2)).reshape(CeI, 9 * CeI)
        w2_arg = jnp.transpose(w2_taps, (1, 0, 2)).reshape(CeO, 10 * CeI)
        w1_spec = pl.BlockSpec(w1_arg.shape, lambda n: (0, 0))
        w2_spec = pl.BlockSpec(w2_arg.shape, lambda n: (0, 0))
    else:
        w1_arg, w2_arg = w1_taps, w2_taps
        w1_spec = pl.BlockSpec(w1_arg.shape, lambda n: (0, 0, 0))
        w2_spec = pl.BlockSpec(w2_arg.shape, lambda n: (0, 0, 0))

    mask = _valid_mask(H, W)
    pool = _pool_matrix(W, G)

    scratch = [pltpu.VMEM((CeI, OFF + Hp + OFF), f32)]   # flat halo image
    if use_im2col:
        scratch.append(pltpu.VMEM((10 * CeI, Hp), f32))  # im2col patches

    kernel = functools.partial(_resblock_kernel, H=H, W=W, OFF=OFF, G=G,
                               use_im2col=use_im2col)

    out_flat = pl.pallas_call(
        kernel,
        out_shape=jax.ShapeDtypeStruct((N // Nb, CeO, Ho * Wo), f32),
        grid=(N // Nb,),
        in_specs=[
            pl.BlockSpec((1, CeI, Hp), lambda n: (n, 0, 0)),
            pl.BlockSpec((1, Hp), lambda n: (0, 0)),
            w1_spec,
            pl.BlockSpec((CeI, 1), lambda n: (0, 0)),
            w2_spec,
            pl.BlockSpec((CeO, 1), lambda n: (0, 0)),
            pl.BlockSpec((2 * G * Wp, G * Wo), lambda n: (0, 0)),
        ],
        out_specs=pl.BlockSpec((1, CeO, Ho * Wo), lambda n: (n, 0, 0)),
        scratch_shapes=scratch,
        compiler_params=pltpu.CompilerParams(
            # On v7x (2 TCs) only the batch-group grid axis is shardable; with
            # N//Nb == 1 one core idles -- acceptable at toy scale, revisit Nb
            # for production batches.
            dimension_semantics=("parallel",),
            # ~150 KB/step footprint: fits every generation (incl. v7x 64 MiB).
            vmem_limit_bytes=32 * 1024 * 1024),
    )(x_stacked, mask, w1_arg, b1_bd, w2_arg, b23_bd, pool)

    # (N//Nb, Nb*Cout, Ho*Wo) -> NCHW via free reshapes only (no transposes).
    return out_flat.reshape(N // Nb, Nb, Cout, Ho, Wo).reshape(N, Cout, Ho, Wo)


# --------------------------------------------------------------------------
# Pure-JAX reference (matches the PyTorch module with norm='instance', nl='relu')
# --------------------------------------------------------------------------
def resblock_reference(x, w1, b1, w2, b2, w3, b3):
    def inorm(v):  # NCHW, biased var, eps=1e-5
        m = v.mean(axis=(2, 3), keepdims=True)
        var = ((v - m) ** 2).mean(axis=(2, 3), keepdims=True)
        return (v - m) / jnp.sqrt(var + EPS)

    def conv(v, w_hwio, b, padding):
        out = jax.lax.conv_general_dilated(
            v, w_hwio, (1, 1), padding,
            dimension_numbers=("NCHW", "HWIO", "NCHW"))
        return out + b[None, :, None, None]

    def avgpool2(v):
        s = jax.lax.reduce_window(v, 0.0, jax.lax.add,
                                  (1, 1, 2, 2), (1, 1, 2, 2), "VALID")
        return s / 4.0

    h = jnp.maximum(inorm(x), 0.0)
    h = conv(h, w1, b1, "SAME")
    h = jnp.maximum(inorm(h), 0.0)
    h = conv(h, w2, b2, "SAME")
    main = avgpool2(h)

    ident = conv(avgpool2(x), w3[None, None, :, :], b3, "VALID")
    return main + ident


if __name__ == "__main__":
    N, Cin, Cout, H, W = 2, 4, 8, 16, 16

    key = jax.random.PRNGKey(0)
    kx, k1, k2, k3, k4, k5, k6 = jax.random.split(key, 7)

    x = jax.random.normal(kx, (N, Cin, H, W), dtype=jnp.float32)
    # deterministic synthetic parameters (HWIO layout for conv weights)
    w1 = jax.random.normal(k1, (3, 3, Cin, Cin), dtype=jnp.float32) * 0.2
    b1 = jax.random.normal(k2, (Cin,), dtype=jnp.float32) * 0.1
    w2 = jax.random.normal(k3, (3, 3, Cin, Cout), dtype=jnp.float32) * 0.2
    b2 = jax.random.normal(k4, (Cout,), dtype=jnp.float32) * 0.1
    w3 = jax.random.normal(k5, (Cin, Cout), dtype=jnp.float32) * 0.2
    b3 = jax.random.normal(k6, (Cout,), dtype=jnp.float32) * 0.1

    out = resblock_forward(x, w1, b1, w2, b2, w3, b3)
    out = jax.block_until_ready(out)

    ref = resblock_reference(x, w1, b1, w2, b2, w3, b3)
    np.testing.assert_allclose(np.asarray(out), np.asarray(ref),
                               rtol=1e-4, atol=1e-4)
    assert out.shape == (N, Cout, H // 2, W // 2)

    print("KERNEL_OK")
</pallas_src>

<mosaic_0001>
module attributes {stable_mosaic.version = 11 : i64} {
  func.func @_resblock_kernel(%arg0: i32, %arg1: memref<1x8x288xf32, #tpu.memory_space<vmem>>, %arg2: memref<1x288xf32, #tpu.memory_space<vmem>>, %arg3: memref<9x8x8xf32, #tpu.memory_space<vmem>>, %arg4: memref<8x1xf32, #tpu.memory_space<vmem>>, %arg5: memref<10x16x8xf32, #tpu.memory_space<vmem>>, %arg6: memref<16x1xf32, #tpu.memory_space<vmem>>, %arg7: memref<288x64xf32, #tpu.memory_space<vmem>>, %arg8: memref<1x16x64xf32, #tpu.memory_space<vmem>>, %arg9: memref<8x544xf32, #tpu.memory_space<vmem>>) attributes {dimension_semantics = [#tpu.dimension_semantics<parallel>], iteration_bounds = array<i64: 1>, scalar_prefetch = 0 : i64, scratch_operands = 1 : i64, tpu.core_type = #tpu.core_type<tc>, window_params = [{transform_indices = @transform_0, window_bounds = array<i64: 1, 8, 288>}, {pipeline_mode = #tpu.pipeline_mode<synchronous>, transform_indices = @transform_1, window_bounds = array<i64: 1, 288>}, {pipeline_mode = #tpu.pipeline_mode<synchronous>, transform_indices = @transform_2, window_bounds = array<i64: 9, 8, 8>}, {pipeline_mode = #tpu.pipeline_mode<synchronous>, transform_indices = @transform_3, window_bounds = array<i64: 8, 1>}, {pipeline_mode = #tpu.pipeline_mode<synchronous>, transform_indices = @transform_4, window_bounds = array<i64: 10, 16, 8>}, {pipeline_mode = #tpu.pipeline_mode<synchronous>, transform_indices = @transform_5, window_bounds = array<i64: 16, 1>}, {pipeline_mode = #tpu.pipeline_mode<synchronous>, transform_indices = @transform_6, window_bounds = array<i64: 288, 64>}, {transform_indices = @transform_7, window_bounds = array<i64: 1, 16, 64>}]} {
    %cst = arith.constant 0.000000e+00 : f32
    %0 = vector.broadcast %cst : f32 to vector<8x128xf32>
    %c0 = arith.constant 0 : index
    %c0_0 = arith.constant 0 : index
    %1 = vector.load %arg9[%c0, %c0_0] : memref<8x544xf32, #tpu.memory_space<vmem>>, vector<8x128xf32>
    tpu.vector_store %arg9[%c0, %c0_0], %0 {strides = array<i32>} : memref<8x544xf32, #tpu.memory_space<vmem>>, vector<8x128xf32>,
    %cst_1 = arith.constant 0.000000e+00 : f32
    %2 = vector.broadcast %cst_1 : f32 to vector<8x128xf32>
    %c0_2 = arith.constant 0 : index
    %c416 = arith.constant 416 : index
    %3 = vector.load %arg9[%c0_2, %c416] : memref<8x544xf32, #tpu.memory_space<vmem>>, vector<8x128xf32>
    tpu.vector_store %arg9[%c0_2, %c416], %2 {strides = array<i32>} : memref<8x544xf32, #tpu.memory_space<vmem>>, vector<8x128xf32>,
    %c0_3 = arith.constant 0 : index
    %c0_4 = arith.constant 0 : index
    %4 = vector.load %arg2[%c0_3, %c0_4] : memref<1x288xf32, #tpu.memory_space<vmem>>, vector<1x288xf32>
    %c0_5 = arith.constant 0 : index
    %c0_6 = arith.constant 0 : index
    %c0_7 = arith.constant 0 : index
    %5 = vector.load %arg1[%c0_5, %c0_6, %c0_7] : memref<1x8x288xf32, #tpu.memory_space<vmem>>, vector<1x8x288xf32>
    %6 = vector.shape_cast %5 : vector<1x8x288xf32> to vector<8x288xf32>
    %cst_8 = arith.constant dense<0.000000e+00> : vector<8xf32>
    %7 = vector.multi_reduction <add>, %6, %cst_8 [1] : vector<8x288xf32> to vector<8xf32>
    %8 = vector.shape_cast %7 : vector<8xf32> to vector<8x1xf32>
    %cst_9 = arith.constant 3.906250e-03 : f32
    %9 = vector.broadcast %cst_9 : f32 to vector<8x1xf32>
    %10 = arith.mulf %8, %9 : vector<8x1xf32>
    %11 = vector.broadcast %10 : vector<8x1xf32> to vector<8x288xf32>
    %12 = arith.subf %6, %11 : vector<8x288xf32>
    %13 = arith.mulf %12, %12 : vector<8x288xf32>
    %cst_10 = arith.constant dense<0.000000e+00> : vector<8xf32>
    %14 = vector.multi_reduction <add>, %13, %cst_10 [1] : vector<8x288xf32> to vector<8xf32>
    %15 = vector.shape_cast %14 : vector<8xf32> to vector<8x1xf32>
    %cst_11 = arith.constant 3.200000e+01 : f32
    %16 = vector.broadcast %cst_11 : f32 to vector<8x1xf32>
    %17 = arith.mulf %16, %10 : vector<8x1xf32>
    %18 = arith.mulf %17, %10 : vector<8x1xf32>
    %19 = arith.subf %15, %18 : vector<8x1xf32>
    %cst_12 = arith.constant 3.906250e-03 : f32
    %20 = vector.broadcast %cst_12 : f32 to vector<8x1xf32>
    %21 = arith.mulf %19, %20 : vector<8x1xf32>
    %cst_13 = arith.constant 0.000000e+00 : f32
    %22 = vector.broadcast %cst_13 : f32 to vector<8x1xf32>
    %23 = arith.maximumf %21, %22 : vector<8x1xf32>
    %cst_14 = arith.constant 9.99999974E-6 : f32
    %24 = vector.broadcast %cst_14 : f32 to vector<8x1xf32>
    %25 = arith.addf %23, %24 : vector<8x1xf32>
    %26 = math.rsqrt %25 : vector<8x1xf32>
    %27 = vector.broadcast %26 : vector<8x1xf32> to vector<8x288xf32>
    %28 = arith.mulf %12, %27 : vector<8x288xf32>
    %cst_15 = arith.constant 0.000000e+00 : f32
    %29 = vector.broadcast %cst_15 : f32 to vector<8x288xf32>
    %30 = arith.maximumf %28, %29 : vector<8x288xf32>
    %31 = vector.broadcast %4 : vector<1x288xf32> to vector<8x288xf32>
    %32 = arith.mulf %30, %31 : vector<8x288xf32>
    %c0_16 = arith.constant 0 : index
    %c128 = arith.constant 128 : index
    %33 = vector.load %arg9[%c0_16, %c128] : memref<8x544xf32, #tpu.memory_space<vmem>>, vector<8x288xf32>
    tpu.vector_store %arg9[%c0_16, %c128], %32 {strides = array<i32>} : memref<8x544xf32, #tpu.memory_space<vmem>>, vector<8x288xf32>,
    %c0_17 = arith.constant 0 : index
    %c0_18 = arith.constant 0 : index
    %c0_19 = arith.constant 0 : index
    %34 = vector.load %arg3[%c0_17, %c0_18, %c0_19] : memref<9x8x8xf32, #tpu.memory_space<vmem>>, vector<1x8x8xf32>
    %35 = vector.shape_cast %34 : vector<1x8x8xf32> to vector<8x8xf32>
    %c0_20 = arith.constant 0 : index
    %c109 = arith.constant 109 : index
    %36 = vector.load %arg9[%c0_20, %c109] : memref<8x544xf32, #tpu.memory_space<vmem>>, vector<8x288xf32>
    %cst_21 = arith.constant dense<0.000000e+00> : vector<8x288xf32>
    %37 = tpu.matmul %35, %36, %cst_21 {dimension_numbers = #tpu.dot_dimension_numbers<[1], [0], [0], [1], [0, 0, 1, 1], [], []>} : vector<8x8xf32>, vector<8x288xf32>, vector<8x288xf32> -> vector<8x288xf32>
    %c1 = arith.constant 1 : index
    %c0_22 = arith.constant 0 : index
    %c0_23 = arith.constant 0 : index
    %38 = vector.load %arg3[%c1, %c0_22, %c0_23] : memref<9x8x8xf32, #tpu.memory_space<vmem>>, vector<1x8x8xf32>
    %39 = vector.shape_cast %38 : vector<1x8x8xf32> to vector<8x8xf32>
    %c0_24 = arith.constant 0 : index
    %c110 = arith.constant 110 : index
    %40 = vector.load %arg9[%c0_24, %c110] : memref<8x544xf32, #tpu.memory_space<vmem>>, vector<8x288xf32>
    %cst_25 = arith.constant dense<0.000000e+00> : vector<8x288xf32>
    %41 = tpu.matmul %39, %40, %cst_25 {dimension_numbers = #tpu.dot_dimension_numbers<[1], [0], [0], [1], [0, 0, 1, 1], [], []>} : vector<8x8xf32>, vector<8x288xf32>, vector<8x288xf32> -> vector<8x288xf32>
    %42 = arith.addf %37, %41 : vector<8x288xf32>
    %c2 = arith.constant 2 : index
    %c0_26 = arith.constant 0 : index
    %c0_27 = arith.constant 0 : index
    %43 = vector.load %arg3[%c2, %c0_26, %c0_27] : memref<9x8x8xf32, #tpu.memory_space<vmem>>, vector<1x8x8xf32>
    %44 = vector.shape_cast %43 : vector<1x8x8xf32> to vector<8x8xf32>
    %c0_28 = arith.constant 0 : index
    %c111 = arith.constant 111 : index
    %45 = vector.load %arg9[%c0_28, %c111] : memref<8x544xf32, #tpu.memory_space<vmem>>, vector<8x288xf32>
    %cst_29 = arith.constant dense<0.000000e+00> : vector<8x288xf32>
    %46 = tpu.matmul %44, %45, %cst_29 {dimension_numbers = #tpu.dot_dimension_numbers<[1], [0], [0], [1], [0, 0, 1, 1], [], []>} : vector<8x8xf32>, vector<8x288xf32>, vector<8x288xf32> -> vector<8x288xf32>
    %47 = arith.addf %42, %46 : vector<8x288xf32>
    %c3 = arith.constant 3 : index
    %c0_30 = arith.constant 0 : index
    %c0_31 = arith.constant 0 : index
    %48 = vector.load %arg3[%c3, %c0_30, %c0_31] : memref<9x8x8xf32, #tpu.memory_space<vmem>>, vector<1x8x8xf32>
    %49 = vector.shape_cast %48 : vector<1x8x8xf32> to vector<8x8xf32>
    %c0_32 = arith.constant 0 : index
    %c127 = arith.constant 127 : index
    %50 = vector.load %arg9[%c0_32, %c127] : memref<8x544xf32, #tpu.memory_space<vmem>>, vector<8x288xf32>
    %cst_33 = arith.constant dense<0.000000e+00> : vector<8x288xf32>
    %51 = tpu.matmul %49, %50, %cst_33 {dimension_numbers = #tpu.dot_dimension_numbers<[1], [0], [0], [1], [0, 0, 1, 1], [], []>} : vector<8x8xf32>, vector<8x288xf32>, vector<8x288xf32> -> vector<8x288xf32>
    %52 = arith.addf %47, %51 : vector<8x288xf32>
    %c4 = arith.constant 4 : index
    %c0_34 = arith.constant 0 : index
    %c0_35 = arith.constant 0 : index
    %53 = vector.load %arg3[%c4, %c0_34, %c0_35] : memref<9x8x8xf32, #tpu.memory_space<vmem>>, vector<1x8x8xf32>
    %54 = vector.shape_cast %53 : vector<1x8x8xf32> to vector<8x8xf32>
    %c0_36 = arith.constant 0 : index
    %c128_37 = arith.constant 128 : index
    %55 = vector.load %arg9[%c0_36, %c128_37] : memref<8x544xf32, #tpu.memory_space<vmem>>, vector<8x288xf32>
    %cst_38 = arith.constant dense<0.000000e+00> : vector<8x288xf32>
    %56 = tpu.matmul %54, %55, %cst_38 {dimension_numbers = #tpu.dot_dimension_numbers<[1], [0], [0], [1], [0, 0, 1, 1], [], []>} : vector<8x8xf32>, vector<8x288xf32>, vector<8x288xf32> -> vector<8x288xf32>
    %57 = arith.addf %52, %56 : vector<8x288xf32>
    %c5 = arith.constant 5 : index
    %c0_39 = arith.constant 0 : index
    %c0_40 = arith.constant 0 : index
    %58 = vector.load %arg3[%c5, %c0_39, %c0_40] : memref<9x8x8xf32, #tpu.memory_space<vmem>>, vector<1x8x8xf32>
    %59 = vector.shape_cast %58 : vector<1x8x8xf32> to vector<8x8xf32>
    %c0_41 = arith.constant 0 : index
    %c129 = arith.constant 129 : index
    %60 = vector.load %arg9[%c0_41, %c129] : memref<8x544xf32, #tpu.memory_space<vmem>>, vector<8x288xf32>
    %cst_42 = arith.constant dense<0.000000e+00> : vector<8x288xf32>
    %61 = tpu.matmul %59, %60, %cst_42 {dimension_numbers = #tpu.dot_dimension_numbers<[1], [0], [0], [1], [0, 0, 1, 1], [], []>} : vector<8x8xf32>, vector<8x288xf32>, vector<8x288xf32> -> vector<8x288xf32>
    %62 = arith.addf %57, %61 : vector<8x288xf32>
    %c6 = arith.constant 6 : index
    %c0_43 = arith.constant 0 : index
    %c0_44 = arith.constant 0 : index
    %63 = vector.load %arg3[%c6, %c0_43, %c0_44] : memref<9x8x8xf32, #tpu.memory_space<vmem>>, vector<1x8x8xf32>
    %64 = vector.shape_cast %63 : vector<1x8x8xf32> to vector<8x8xf32>
    %c0_45 = arith.constant 0 : index
    %c145 = arith.constant 145 : index
    %65 = vector.load %arg9[%c0_45, %c145] : memref<8x544xf32, #tpu.memory_space<vmem>>, vector<8x288xf32>
    %cst_46 = arith.constant dense<0.000000e+00> : vector<8x288xf32>
    %66 = tpu.matmul %64, %65, %cst_46 {dimension_numbers = #tpu.dot_dimension_numbers<[1], [0], [0], [1], [0, 0, 1, 1], [], []>} : vector<8x8xf32>, vector<8x288xf32>, vector<8x288xf32> -> vector<8x288xf32>
    %67 = arith.addf %62, %66 : vector<8x288xf32>
    %c7 = arith.constant 7 : index
    %c0_47 = arith.constant 0 : index
    %c0_48 = arith.constant 0 : index
    %68 = vector.load %arg3[%c7, %c0_47, %c0_48] : memref<9x8x8xf32, #tpu.memory_space<vmem>>, vector<1x8x8xf32>
    %69 = vector.shape_cast %68 : vector<1x8x8xf32> to vector<8x8xf32>
    %c0_49 = arith.constant 0 : index
    %c146 = arith.constant 146 : index
    %70 = vector.load %arg9[%c0_49, %c146] : memref<8x544xf32, #tpu.memory_space<vmem>>, vector<8x288xf32>
    %cst_50 = arith.constant dense<0.000000e+00> : vector<8x288xf32>
    %71 = tpu.matmul %69, %70, %cst_50 {dimension_numbers = #tpu.dot_dimension_numbers<[1], [0], [0], [1], [0, 0, 1, 1], [], []>} : vector<8x8xf32>, vector<8x288xf32>, vector<8x288xf32> -> vector<8x288xf32>
    %72 = arith.addf %67, %71 : vector<8x288xf32>
    %c8 = arith.constant 8 : index
    %c0_51 = arith.constant 0 : index
    %c0_52 = arith.constant 0 : index
    %73 = vector.load %arg3[%c8, %c0_51, %c0_52] : memref<9x8x8xf32, #tpu.memory_space<vmem>>, vector<1x8x8xf32>
    %74 = vector.shape_cast %73 : vector<1x8x8xf32> to vector<8x8xf32>
    %c0_53 = arith.constant 0 : index
    %c147 = arith.constant 147 : index
    %75 = vector.load %arg9[%c0_53, %c147] : memref<8x544xf32, #tpu.memory_space<vmem>>, vector<8x288xf32>
    %cst_54 = arith.constant dense<0.000000e+00> : vector<8x288xf32>
    %76 = tpu.matmul %74, %75, %cst_54 {dimension_numbers = #tpu.dot_dimension_numbers<[1], [0], [0], [1], [0, 0, 1, 1], [], []>} : vector<8x8xf32>, vector<8x288xf32>, vector<8x288xf32> -> vector<8x288xf32>
    %77 = arith.addf %72, %76 : vector<8x288xf32>
    %c0_55 = arith.constant 0 : index
    %c0_56 = arith.constant 0 : index
    %78 = vector.load %arg4[%c0_55, %c0_56] : memref<8x1xf32, #tpu.memory_space<vmem>>, vector<8x1xf32>
    %79 = vector.broadcast %78 : vector<8x1xf32> to vector<8x288xf32>
    %80 = arith.addf %77, %79 : vector<8x288xf32>
    %81 = vector.broadcast %4 : vector<1x288xf32> to vector<8x288xf32>
    %82 = arith.mulf %80, %81 : vector<8x288xf32>
    %cst_57 = arith.constant dense<0.000000e+00> : vector<8xf32>
    %83 = vector.multi_reduction <add>, %82, %cst_57 [1] : vector<8x288xf32> to vector<8xf32>
    %84 = vector.shape_cast %83 : vector<8xf32> to vector<8x1xf32>
    %cst_58 = arith.constant 3.906250e-03 : f32
    %85 = vector.broadcast %cst_58 : f32 to vector<8x1xf32>
    %86 = arith.mulf %84, %85 : vector<8x1xf32>
    %87 = vector.broadcast %86 : vector<8x1xf32> to vector<8x288xf32>
    %88 = arith.subf %82, %87 : vector<8x288xf32>
    %89 = arith.mulf %88, %88 : vector<8x288xf32>
    %cst_59 = arith.constant dense<0.000000e+00> : vector<8xf32>
    %90 = vector.multi_reduction <add>, %89, %cst_59 [1] : vector<8x288xf32> to vector<8xf32>
    %91 = vector.shape_cast %90 : vector<8xf32> to vector<8x1xf32>
    %cst_60 = arith.constant 3.200000e+01 : f32
    %92 = vector.broadcast %cst_60 : f32 to vector<8x1xf32>
    %93 = arith.mulf %92, %86 : vector<8x1xf32>
    %94 = arith.mulf %93, %86 : vector<8x1xf32>
    %95 = arith.subf %91, %94 : vector<8x1xf32>
    %cst_61 = arith.constant 3.906250e-03 : f32
    %96 = vector.broadcast %cst_61 : f32 to vector<8x1xf32>
    %97 = arith.mulf %95, %96 : vector<8x1xf32>
    %cst_62 = arith.constant 0.000000e+00 : f32
    %98 = vector.broadcast %cst_62 : f32 to vector<8x1xf32>
    %99 = arith.maximumf %97, %98 : vector<8x1xf32>
    %cst_63 = arith.constant 9.99999974E-6 : f32
    %100 = vector.broadcast %cst_63 : f32 to vector<8x1xf32>
    %101 = arith.addf %99, %100 : vector<8x1xf32>
    %102 = math.rsqrt %101 : vector<8x1xf32>
    %103 = vector.broadcast %102 : vector<8x1xf32> to vector<8x288xf32>
    %104 = arith.mulf %88, %103 : vector<8x288xf32>
    %cst_64 = arith.constant 0.000000e+00 : f32
    %105 = vector.broadcast %cst_64 : f32 to vector<8x288xf32>
    %106 = arith.maximumf %104, %105 : vector<8x288xf32>
    %107 = vector.broadcast %4 : vector<1x288xf32> to vector<8x288xf32>
    %108 = arith.mulf %106, %107 : vector<8x288xf32>
    %c0_65 = arith.constant 0 : index
    %c128_66 = arith.constant 128 : index
    %109 = vector.load %arg9[%c0_65, %c128_66] : memref<8x544xf32, #tpu.memory_space<vmem>>, vector<8x288xf32>
    tpu.vector_store %arg9[%c0_65, %c128_66], %108 {strides = array<i32>} : memref<8x544xf32, #tpu.memory_space<vmem>>, vector<8x288xf32>,
    %c0_67 = arith.constant 0 : index
    %c0_68 = arith.constant 0 : index
    %c0_69 = arith.constant 0 : index
    %110 = vector.load %arg5[%c0_67, %c0_68, %c0_69] : memref<10x16x8xf32, #tpu.memory_space<vmem>>, vector<1x16x8xf32>
    %111 = vector.shape_cast %110 : vector<1x16x8xf32> to vector<16x8xf32>
    %c0_70 = arith.constant 0 : index
    %c109_71 = arith.constant 109 : index
    %112 = vector.load %arg9[%c0_70, %c109_71] : memref<8x544xf32, #tpu.memory_space<vmem>>, vector<8x288xf32>
    %cst_72 = arith.constant dense<0.000000e+00> : vector<16x288xf32>
    %113 = tpu.matmul %111, %112, %cst_72 {dimension_numbers = #tpu.dot_dimension_numbers<[1], [0], [0], [1], [0, 0, 1, 1], [], []>} : vector<16x8xf32>, vector<8x288xf32>, vector<16x288xf32> -> vector<16x288xf32>
    %c1_73 = arith.constant 1 : index
    %c0_74 = arith.constant 0 : index
    %c0_75 = arith.constant 0 : index
    %114 = vector.load %arg5[%c1_73, %c0_74, %c0_75] : memref<10x16x8xf32, #tpu.memory_space<vmem>>, vector<1x16x8xf32>
    %115 = vector.shape_cast %114 : vector<1x16x8xf32> to vector<16x8xf32>
    %c0_76 = arith.constant 0 : index
    %c110_77 = arith.constant 110 : index
    %116 = vector.load %arg9[%c0_76, %c110_77] : memref<8x544xf32, #tpu.memory_space<vmem>>, vector<8x288xf32>
    %cst_78 = arith.constant dense<0.000000e+00> : vector<16x288xf32>
    %117 = tpu.matmul %115, %116, %cst_78 {dimension_numbers = #tpu.dot_dimension_numbers<[1], [0], [0], [1], [0, 0, 1, 1], [], []>} : vector<16x8xf32>, vector<8x288xf32>, vector<16x288xf32> -> vector<16x288xf32>
    %118 = arith.addf %113, %117 : vector<16x288xf32>
    %c2_79 = arith.constant 2 : index
    %c0_80 = arith.constant 0 : index
    %c0_81 = arith.constant 0 : index
    %119 = vector.load %arg5[%c2_79, %c0_80, %c0_81] : memref<10x16x8xf32, #tpu.memory_space<vmem>>, vector<1x16x8xf32>
    %120 = vector.shape_cast %119 : vector<1x16x8xf32> to vector<16x8xf32>
    %c0_82 = arith.constant 0 : index
    %c111_83 = arith.constant 111 : index
    %121 = vector.load %arg9[%c0_82, %c111_83] : memref<8x544xf32, #tpu.memory_space<vmem>>, vector<8x288xf32>
    %cst_84 = arith.constant dense<0.000000e+00> : vector<16x288xf32>
    %122 = tpu.matmul %120, %121, %cst_84 {dimension_numbers = #tpu.dot_dimension_numbers<[1], [0], [0], [1], [0, 0, 1, 1], [], []>} : vector<16x8xf32>, vector<8x288xf32>, vector<16x288xf32> -> vector<16x288xf32>
    %123 = arith.addf %118, %122 : vector<16x288xf32>
    %c3_85 = arith.constant 3 : index
    %c0_86 = arith.constant 0 : index
    %c0_87 = arith.constant 0 : index
    %124 = vector.load %arg5[%c3_85, %c0_86, %c0_87] : memref<10x16x8xf32, #tpu.memory_space<vmem>>, vector<1x16x8xf32>
    %125 = vector.shape_cast %124 : vector<1x16x8xf32> to vector<16x8xf32>
    %c0_88 = arith.constant 0 : index
    %c127_89 = arith.constant 127 : index
    %126 = vector.load %arg9[%c0_88, %c127_89] : memref<8x544xf32, #tpu.memory_space<vmem>>, vector<8x288xf32>
    %cst_90 = arith.constant dense<0.000000e+00> : vector<16x288xf32>
    %127 = tpu.matmul %125, %126, %cst_90 {dimension_numbers = #tpu.dot_dimension_numbers<[1], [0], [0], [1], [0, 0, 1, 1], [], []>} : vector<16x8xf32>, vector<8x288xf32>, vector<16x288xf32> -> vector<16x288xf32>
    %128 = arith.addf %123, %127 : vector<16x288xf32>
    %c4_91 = arith.constant 4 : index
    %c0_92 = arith.constant 0 : index
    %c0_93 = arith.constant 0 : index
    %129 = vector.load %arg5[%c4_91, %c0_92, %c0_93] : memref<10x16x8xf32, #tpu.memory_space<vmem>>, vector<1x16x8xf32>
    %130 = vector.shape_cast %129 : vector<1x16x8xf32> to vector<16x8xf32>
    %c0_94 = arith.constant 0 : index
    %c128_95 = arith.constant 128 : index
    %131 = vector.load %arg9[%c0_94, %c128_95] : memref<8x544xf32, #tpu.memory_space<vmem>>, vector<8x288xf32>
    %cst_96 = arith.constant dense<0.000000e+00> : vector<16x288xf32>
    %132 = tpu.matmul %130, %131, %cst_96 {dimension_numbers = #tpu.dot_dimension_numbers<[1], [0], [0], [1], [0, 0, 1, 1], [], []>} : vector<16x8xf32>, vector<8x288xf32>, vector<16x288xf32> -> vector<16x288xf32>
    %133 = arith.addf %128, %132 : vector<16x288xf32>
    %c5_97 = arith.constant 5 : index
    %c0_98 = arith.constant 0 : index
    %c0_99 = arith.constant 0 : index
    %134 = vector.load %arg5[%c5_97, %c0_98, %c0_99] : memref<10x16x8xf32, #tpu.memory_space<vmem>>, vector<1x16x8xf32>
    %135 = vector.shape_cast %134 : vector<1x16x8xf32> to vector<16x8xf32>
    %c0_100 = arith.constant 0 : index
    %c129_101 = arith.constant 129 : index
    %136 = vector.load %arg9[%c0_100, %c129_101] : memref<8x544xf32, #tpu.memory_space<vmem>>, vector<8x288xf32>
    %cst_102 = arith.constant dense<0.000000e+00> : vector<16x288xf32>
    %137 = tpu.matmul %135, %136, %cst_102 {dimension_numbers = #tpu.dot_dimension_numbers<[1], [0], [0], [1], [0, 0, 1, 1], [], []>} : vector<16x8xf32>, vector<8x288xf32>, vector<16x288xf32> -> vector<16x288xf32>
    %138 = arith.addf %133, %137 : vector<16x288xf32>
    %c6_103 = arith.constant 6 : index
    %c0_104 = arith.constant 0 : index
    %c0_105 = arith.constant 0 : index
    %139 = vector.load %arg5[%c6_103, %c0_104, %c0_105] : memref<10x16x8xf32, #tpu.memory_space<vmem>>, vector<1x16x8xf32>
    %140 = vector.shape_cast %139 : vector<1x16x8xf32> to vector<16x8xf32>
    %c0_106 = arith.constant 0 : index
    %c145_107 = arith.constant 145 : index
    %141 = vector.load %arg9[%c0_106, %c145_107] : memref<8x544xf32, #tpu.memory_space<vmem>>, vector<8x288xf32>
    %cst_108 = arith.constant dense<0.000000e+00> : vector<16x288xf32>
    %142 = tpu.matmul %140, %141, %cst_108 {dimension_numbers = #tpu.dot_dimension_numbers<[1], [0], [0], [1], [0, 0, 1, 1], [], []>} : vector<16x8xf32>, vector<8x288xf32>, vector<16x288xf32> -> vector<16x288xf32>
    %143 = arith.addf %138, %142 : vector<16x288xf32>
    %c7_109 = arith.constant 7 : index
    %c0_110 = arith.constant 0 : index
    %c0_111 = arith.constant 0 : index
    %144 = vector.load %arg5[%c7_109, %c0_110, %c0_111] : memref<10x16x8xf32, #tpu.memory_space<vmem>>, vector<1x16x8xf32>
    %145 = vector.shape_cast %144 : vector<1x16x8xf32> to vector<16x8xf32>
    %c0_112 = arith.constant 0 : index
    %c146_113 = arith.constant 146 : index
    %146 = vector.load %arg9[%c0_112, %c146_113] : memref<8x544xf32, #tpu.memory_space<vmem>>, vector<8x288xf32>
    %cst_114 = arith.constant dense<0.000000e+00> : vector<16x288xf32>
    %147 = tpu.matmul %145, %146, %cst_114 {dimension_numbers = #tpu.dot_dimension_numbers<[1], [0], [0], [1], [0, 0, 1, 1], [], []>} : vector<16x8xf32>, vector<8x288xf32>, vector<16x288xf32> -> vector<16x288xf32>
    %148 = arith.addf %143, %147 : vector<16x288xf32>
    %c8_115 = arith.constant 8 : index
    %c0_116 = arith.constant 0 : index
    %c0_117 = arith.constant 0 : index
    %149 = vector.load %arg5[%c8_115, %c0_116, %c0_117] : memref<10x16x8xf32, #tpu.memory_space<vmem>>, vector<1x16x8xf32>
    %150 = vector.shape_cast %149 : vector<1x16x8xf32> to vector<16x8xf32>
    %c0_118 = arith.constant 0 : index
    %c147_119 = arith.constant 147 : index
    %151 = vector.load %arg9[%c0_118, %c147_119] : memref<8x544xf32, #tpu.memory_space<vmem>>, vector<8x288xf32>
    %cst_120 = arith.constant dense<0.000000e+00> : vector<16x288xf32>
    %152 = tpu.matmul %150, %151, %cst_120 {dimension_numbers = #tpu.dot_dimension_numbers<[1], [0], [0], [1], [0, 0, 1, 1], [], []>} : vector<16x8xf32>, vector<8x288xf32>, vector<16x288xf32> -> vector<16x288xf32>
    %153 = arith.addf %148, %152 : vector<16x288xf32>
    %c9 = arith.constant 9 : index
    %c0_121 = arith.constant 0 : index
    %c0_122 = arith.constant 0 : index
    %154 = vector.load %arg5[%c9, %c0_121, %c0_122] : memref<10x16x8xf32, #tpu.memory_space<vmem>>, vector<1x16x8xf32>
    %155 = vector.shape_cast %154 : vector<1x16x8xf32> to vector<16x8xf32>
    %cst_123 = arith.constant dense<0.000000e+00> : vector<16x288xf32>
    %156 = tpu.matmul %155, %6, %cst_123 {dimension_numbers = #tpu.dot_dimension_numbers<[1], [0], [0], [1], [0, 0, 1, 1], [], []>} : vector<16x8xf32>, vector<8x288xf32>, vector<16x288xf32> -> vector<16x288xf32>
    %157 = arith.addf %153, %156 : vector<16x288xf32>
    %c0_124 = arith.constant 0 : index
    %c0_125 = arith.constant 0 : index
    %158 = vector.load %arg6[%c0_124, %c0_125] : memref<16x1xf32, #tpu.memory_space<vmem>>, vector<16x1xf32>
    %159 = vector.broadcast %158 : vector<16x1xf32> to vector<16x288xf32>
    %160 = arith.addf %157, %159 : vector<16x288xf32>
    %c0_126 = arith.constant 0 : index
    %c0_127 = arith.constant 0 : index
    %161 = vector.load %arg7[%c0_126, %c0_127] : memref<288x64xf32, #tpu.memory_space<vmem>>, vector<288x64xf32>
    %cst_128 = arith.constant dense<0.000000e+00> : vector<16x64xf32>
    %162 = tpu.matmul %160, %161, %cst_128 {dimension_numbers = #tpu.dot_dimension_numbers<[1], [0], [0], [1], [0, 0, 1, 1], [], []>} : vector<16x288xf32>, vector<288x64xf32>, vector<16x64xf32> -> vector<16x64xf32>
    %c0_129 = arith.constant 0 : index
    %c0_130 = arith.constant 0 : index
    %c0_131 = arith.constant 0 : index
    %163 = vector.load %arg8[%c0_129, %c0_130, %c0_131] : memref<1x16x64xf32, #tpu.memory_space<vmem>>, vector<1x16x64xf32>
    %164 = vector.shape_cast %163 : vector<1x16x64xf32> to vector<16x64xf32>
    %165 = vector.shape_cast %162 : vector<16x64xf32> to vector<1x16x64xf32>
    tpu.vector_store %arg8[%c0_129, %c0_130, %c0_131], %165 {strides = array<i32>} : memref<1x16x64xf32, #tpu.memory_space<vmem>>, vector<1x16x64xf32>,
    return
  }
  func.func @transform_0(%arg0: i32) -> (i32, i32, i32) {
    %c0_i32 = arith.constant 0 : i32
    %c0_i32_0 = arith.constant 0 : i32
    %c0_i32_1 = arith.constant 0 : i32
    return %arg0, %c0_i32, %c0_i32_0 : i32, i32, i32
  }
  func.func @transform_1(%arg0: i32) -> (i32, i32) {
    %c0_i32 = arith.constant 0 : i32
    %c0_i32_0 = arith.constant 0 : i32
    %c0_i32_1 = arith.constant 0 : i32
    return %c0_i32, %c0_i32_0 : i32, i32
  }
  func.func @transform_2(%arg0: i32) -> (i32, i32, i32) {
    %c0_i32 = arith.constant 0 : i32
    %c0_i32_0 = arith.constant 0 : i32
    %c0_i32_1 = arith.constant 0 : i32
    %c0_i32_2 = arith.constant 0 : i32
    return %c0_i32, %c0_i32_0, %c0_i32_1 : i32, i32, i32
  }
  func.func @transform_3(%arg0: i32) -> (i32, i32) {
    %c0_i32 = arith.constant 0 : i32
    %c0_i32_0 = arith.constant 0 : i32
    %c0_i32_1 = arith.constant 0 : i32
    return %c0_i32, %c0_i32_0 : i32, i32
  }
  func.func @transform_4(%arg0: i32) -> (i32, i32, i32) {
    %c0_i32 = arith.constant 0 : i32
    %c0_i32_0 = arith.constant 0 : i32
    %c0_i32_1 = arith.constant 0 : i32
    %c0_i32_2 = arith.constant 0 : i32
    return %c0_i32, %c0_i32_0, %c0_i32_1 : i32, i32, i32
  }
  func.func @transform_5(%arg0: i32) -> (i32, i32) {
    %c0_i32 = arith.constant 0 : i32
    %c0_i32_0 = arith.constant 0 : i32
    %c0_i32_1 = arith.constant 0 : i32
    return %c0_i32, %c0_i32_0 : i32, i32
  }
  func.func @transform_6(%arg0: i32) -> (i32, i32) {
    %c0_i32 = arith.constant 0 : i32
    %c0_i32_0 = arith.constant 0 : i32
    %c0_i32_1 = arith.constant 0 : i32
    return %c0_i32, %c0_i32_0 : i32, i32
  }
  func.func @transform_7(%arg0: i32) -> (i32, i32, i32) {
    %c0_i32 = arith.constant 0 : i32
    %c0_i32_0 = arith.constant 0 : i32
    %c0_i32_1 = arith.constant 0 : i32
    return %arg0, %c0_i32, %c0_i32_0 : i32, i32, i32
  }
}

</mosaic_0001>

<bundles_post_ra>
// kernel: tile.18
= control target key start
LH: loop header
LB: loop body
LE: loop exit
PB: predicated region body
PF: predicated region fallthrough
CT: control target
= control target key end

     0   :  { %s22_s0 = inlined_call_operand.vmem [shape: f32[8], index: 0, kind: input, shape index: {}]   ;;  %s23_s1 = inlined_call_operand.vmem [shape: f32[2,8], index: 1, kind: output, shape index: {}]  }
   0x1   :  { %v4_v0 = vld [vmem:[%s22_s0] ss:$0 sm:$0xff] }
   0x2   :  { %5 = vst [vmem:[%s23_s1] sm:$0x3] %v4_v0 }

// kernel: tile.1
= control target key start
LH: loop header
LB: loop body
LE: loop exit
PB: predicated region body
PF: predicated region fallthrough
CT: control target
= control target key end

     0   :  { %s67_s8 = smov 125   ;;  %vm8_vm0 = vcmask 7168   ;;  %s68_s11 = smov 126   ;;  %s118_s0 = inlined_call_operand.vmem [shape: f32[2,8], index: 0, kind: input, shape index: {}]   ;;  %s119_s1 = inlined_call_operand.vmem [shape: f32[16,1], index: 1, kind: output, shape index: {}]  }
   0x1   :  { %v5_v0 = vld [vmem:[%s118_s0] sm:$0x3]  ;;  %s66_s0 = smov 127   ;;  %s69_s12 = smov 124  }
   0x2   :  { %6 = vst [vmem:[#allocation0] sm:$0x3] %v5_v0  ;;  %s70_s13 = smov 123   ;;  %s71_s14 = smov 122  }
   0x3   :  { %s72_s15 = smov 121  }
   0x9   :  { %v10_v1 = vld [vmem:[#allocation0] sm:$0x3]  }
   0xa   :  { %v22_v2 = vld [vmem:[#allocation0] sm:$0x3]   ;;  %11 = vrot.lane.b32.xlu0 %v10_v1, %s66_s0 }
   0xb   :  { %23 = vrot.lane.b32.xlu1 %v22_v2, %s67_s8  ;;  %v16_v3 = vld [vmem:[#allocation0] sm:$0x3]  }
   0xc   :  { %v28_v4 = vld [vmem:[#allocation0] sm:$0x3]  }
   0xd   :  { %v7_v5 = vld [vmem:[#allocation0] sm:$0x3]  }
   0xe   :  { %9 = vst.msk [vmem:[%s119_s1] ss:$8 sm:$0x3] %vm8_vm0, %v7_v5   ;;  %17 = vrot.lane.b32.xlu0 %v16_v3, %s68_s11  ;;  %v34_v6 = vld [vmem:[#allocation0] sm:$0x3]  }
   0xf   :  { %29 = vrot.lane.b32.xlu1 %v28_v4, %s69_s12  ;;  %v40_v7 = vld [vmem:[#allocation0] sm:$0x3]  }
  0x10   :  { %v46_v8 = vld [vmem:[#allocation0] sm:$0x3]  }
  0x12   :  { %35 = vrot.lane.b32.xlu0 %v34_v6, %s70_s13 }
  0x13   :  { %41 = vrot.lane.b32.xlu1 %v40_v7, %s71_s14 }
  0x16   :  { %47 = vrot.lane.b32.xlu0 %v46_v8, %s72_s15 }
  0x7c   :  { %v12_v9 = vpop.permute.xlu0 %11  }
  0x7d   :  { %v24_v10 = vpop.permute.xlu1 %23   ;;  %52 = vst.msk [vmem:[%s119_s1 + $0x1] ss:$8 sm:$0x3] %vm8_vm0, %v12_v9  }
  0x7e   :  { %54 = vst.msk [vmem:[%s119_s1 + $0x3] ss:$8 sm:$0x3] %vm8_vm0, %v24_v10  }
  0x80   :  { %v18_v11 = vpop.permute.xlu0 %17  }
  0x81   :  { %v30_v12 = vpop.permute.xlu1 %29   ;;  %53 = vst.msk [vmem:[%s119_s1 + $0x2] ss:$8 sm:$0x3] %vm8_vm0, %v18_v11  }
  0x82   :  { %55 = vst.msk [vmem:[%s119_s1 + $0x4] ss:$8 sm:$0x3] %vm8_vm0, %v30_v12  }
  0x84   :  { %v36_v13 = vpop.permute.xlu0 %35  }
  0x85   :  { %v42_v14 = vpop.permute.xlu1 %41   ;;  %56 = vst.msk [vmem:[%s119_s1 + $0x5] ss:$8 sm:$0x3] %vm8_vm0, %v36_v13  }
  0x86   :  { %57 = vst.msk [vmem:[%s119_s1 + $0x6] ss:$8 sm:$0x3] %vm8_vm0, %v42_v14  }
  0x88   :  { %v48_v15 = vpop.permute.xlu0 %47  }
  0x89   :  { %58 = vst.msk [vmem:[%s119_s1 + $0x7] ss:$8 sm:$0x3] %vm8_vm0, %v48_v15  }

// kernel: tile.13
= control target key start
LH: loop header
LB: loop body
LE: loop exit
PB: predicated region body
PF: predicated region fallthrough
CT: control target
= control target key end

     0   :  { %s22_s0 = inlined_call_operand.vmem [shape: f32[4], index: 0, kind: input, shape index: {}]   ;;  %s23_s1 = inlined_call_operand.vmem [shape: f32[2,4], index: 1, kind: output, shape index: {}]  }
   0x1   :  { %v4_v0 = vld [vmem:[%s22_s0] ss:$0 sm:$0xff] }
   0x2   :  { %5 = vst [vmem:[%s23_s1] sm:$0x3] %v4_v0 }

// kernel: tile.0
= control target key start
LH: loop header
LB: loop body
LE: loop exit
PB: predicated region body
PF: predicated region fallthrough
CT: control target
= control target key end

     0   :  { %s35_s8 = smov 125   ;;  %vm8_vm0 = vcmask 7168   ;;  %s36_s11 = smov 126   ;;  %s62_s0 = inlined_call_operand.vmem [shape: f32[2,4], index: 0, kind: input, shape index: {}]   ;;  %s63_s1 = inlined_call_operand.vmem [shape: f32[8,1], index: 1, kind: output, shape index: {}]  }
   0x1   :  { %v5_v0 = vld [vmem:[%s62_s0] sm:$0x3]  ;;  %s34_s0 = smov 127  }
   0x2   :  { %6 = vst [vmem:[#allocation0] sm:$0x3] %v5_v0 }
   0x9   :  { %v10_v1 = vld [vmem:[#allocation0] sm:$0x3]  }
   0xa   :  { %v22_v2 = vld [vmem:[#allocation0] sm:$0x3]   ;;  %11 = vrot.lane.b32.xlu0 %v10_v1, %s34_s0 }
   0xb   :  { %23 = vrot.lane.b32.xlu1 %v22_v2, %s35_s8  ;;  %v7_v3 = vld [vmem:[#allocation0] sm:$0x3]  }
   0xc   :  { %v16_v4 = vld [vmem:[#allocation0] sm:$0x3]   ;;  %9 = vst.msk [vmem:[%s63_s1] ss:$4 sm:$0x3] %vm8_vm0, %v7_v3  }
   0xe   :  { %17 = vrot.lane.b32.xlu0 %v16_v4, %s36_s11 }
  0x7c   :  { %v12_v5 = vpop.permute.xlu0 %11  }
  0x7d   :  { %v24_v6 = vpop.permute.xlu1 %23   ;;  %28 = vst.msk [vmem:[%s63_s1 + $0x1] ss:$4 sm:$0x3] %vm8_vm0, %v12_v5  }
  0x7e   :  { %30 = vst.msk [vmem:[%s63_s1 + $0x3] ss:$4 sm:$0x3] %vm8_vm0, %v24_v6  }
  0x80   :  { %v18_v7 = vpop.permute.xlu0 %17  }
  0x81   :  { %29 = vst.msk [vmem:[%s63_s1 + $0x2] ss:$4 sm:$0x3] %vm8_vm0, %v18_v7  }

// kernel: resblock_forward.1
= control target key start
LH: loop header
LB: loop body
LE: loop exit
PB: predicated region body
PF: predicated region fallthrough
CT: control target
= control target key end

     0   :  { %vm29_vm0 = vcmask 261120   ;;  %v3873_v3 = vmov 0.0   ;;  %vm27_vm1 = vcmask 1047808   ;;  %s3874_s30 = smov 19   ;;  %s3875_s8 = smov 17   ;;  %v66_v25 = vlaneseq  ;;  %s4461_s0 = inlined_call_operand.vmem [shape: f32[1,8,288], index: 0, kind: input, shape index: {}]   ;;  %s4462_s1 = inlined_call_operand.vmem [shape: f32[1,288], index: 1, kind: input, shape index: {}]   ;;  %s4463_s3 = inlined_call_operand.vmem [shape: f32[8,1], index: 3, kind: input, shape index: {}]   ;;  %s4464_s2 = inlined_call_operand.vmem [shape: f32[9,8,8], index: 2, kind: input, shape index: {}]   ;;  %s4465_s4 = inlined_call_operand.vmem [shape: f32[10,16,8], index: 4, kind: input, shape index: {}]   ;;  %s4466_s5 = inlined_call_operand.vmem [shape: f32[16,1], index: 5, kind: input, shape index: {}]   ;;  %s4467_s6 = inlined_call_operand.vmem [shape: f32[288,64], index: 6, kind: input, shape index: {}]   ;;  %s4468_s7 = inlined_call_operand.vmem [shape: f32[1,16,64], index: 7, kind: output, shape index: {}]  }
   0x1   :  { %v32_v0 = vld [vmem:[%s4461_s0] sm:$0xff]  ;;  %v33_v1 = vld [vmem:[%s4461_s0 + $0x8] sm:$0xff]  ;;  %v34_v2 = vld [vmem:[%s4461_s0 + $0x10] sm:$0xff]  ;;  %26 = vst [vmem:[#allocation2] sm:$0xff] %v3873_v3  ;;  %181 = vmatprep.mubr.f32.mxu0 %v3873_v3  ;;  %3751 = vmatprep.subr.mxu1 %v3873_v3  ;;  %s3876_s9 = smov 1   ;;  %s3877_s10 = smov 18  }
   0x2   :  { %v35_v4 = vadd.f32 %v33_v1, %v32_v0  ;;  %v36_v5 = vsel %vm29_vm0, %v34_v2, 0.0  ;;  %28 = vst.msk [vmem:[#allocation2 + $0x18] sm:$0xff] %vm27_vm1, %v3873_v3  ;;  %258 = vrot.lane.b32.xlu1 %v3873_v3, %s3874_s30  ;;  %v67_v26 = vshrl.u32 %v66_v25, 7  ;;  %v31_v29 = vld [vmem:[%s4462_s1] sm:$0x7]  ;;  %vm3878_vm2 = vmmov 0  }
   0x3   :  { %3753 = vmatprep.mubr.msk.f32.mxu1 %vm3878_vm2, %v3873_v3  ;;  %s3879_s1 = smov 127   ;;  %s3880_s13 = smov 111   ;;  %v3883_v45 = vmov 0   ;;  %v1538_v46 = vld [vmem:[%s4463_s3] sm:$0xff]  ;;  %vm106_vm3 = vcmask 146432   ;;  %v3568_v55 = vld [vmem:[%s4464_s2 + $0x8] sm:$0xff] }
   0x4   :  { %v37_v6 = vadd.f32 %v36_v5, %v35_v4  ;;  %v68_v27 = vsub.s32 0, %v67_v26  ;;  %v72_v28 = vsub.s32 1, %v67_v26  ;;  %v76_v30 = vsub.s32 2, %v67_v26  ;;  %s3881_s14 = smov 110   ;;  %s3882_s15 = smov 109   ;;  %3863 = vset.pattern.permute.xlu1 %v3883_v45  ;;  %3864 = vset.pattern.permute.xlu0 %v3883_v45 }
   0x5   :  { %vm113_vm4 = vcmask 64512   ;;  %vm266_vm5 = vcmask 154624   ;;  %vm427_vm6 = vcmask 138240   ;;  %vm591_vm7 = vcmask 7168  }
   0x6   :  { %38 = vadd.xlane.f32.xlu0 %v37_v6  ;;  %419 = vrot.lane.b32.xlu1 %v3873_v3, %s3875_s8  ;;  %v3950_v32 = vrot.slane %v31_v29, %v68_v27  ;;  %v3952_v33 = vrot.slane %v31_v29, %v72_v28  ;;  %v3954_v34 = vrot.slane %v31_v29, %v76_v30  ;;  %vm902_vm8 = vcmask 1039360   ;;  %v3585_v28 = vld [vmem:[%s4464_s2 + $0x30] sm:$0xff] }
   0x7   :  { %vm1063_vm9 = vcmask 908288   ;;  %vm1224_vm10 = vcmask 900096   ;;  %vm1385_vm11 = vcmask 891904   ;;  %vm3561_vm12 = vcmask 523264  }
   0xa   :  { %583 = vrot.lane.b32.xlu1 %v3873_v3, %s3876_s9 }
  0x74   :  { %v259_v47 = vpop.permute.xlu1 %258 }
  0x78   :  { %v420_v48 = vpop.permute.xlu1 %419 }
  0x7c   :  { %v584_v49 = vpop.permute.xlu1 %583 }
  0x8f   :  { %v39_v7 = vpop.xlane.xlu0 %38 }
  0x90   :  { %v40_v8 = vmul.f32 0.00390625, %v39_v7 }
  0x92   :  { %v41_v9 = vsub.f32 %v32_v0, %v40_v8  ;;  %v42_v10 = vsub.f32 %v33_v1, %v40_v8  ;;  %v43_v11 = vsub.f32 %v34_v2, %v40_v8  ;;  %v52_v18 = vmul.f32 32.0, %v40_v8  ;;  %v87_v1 = vld [vmem:[%s4464_s2] sm:$0xff] }
  0x94   :  { %v44_v12 = vmul.f32 %v41_v9, %v41_v9  ;;  %v45_v13 = vmul.f32 %v42_v10, %v42_v10  ;;  %v46_v14 = vmul.f32 %v43_v11, %v43_v11  ;;  %v53_v19 = vmul.f32 %v52_v18, %v40_v8 }
  0x96   :  { %v47_v15 = vadd.f32 %v45_v13, %v44_v12  ;;  %v48_v16 = vsel %vm29_vm0, %v46_v14, 0.0 }
  0x98   :  { %v49_v17 = vadd.f32 %v48_v16, %v47_v15  ;;  %v3576_v15 = vld [vmem:[%s4464_s2 + $0x18] sm:$0xff] }
  0x9a   :  { %50 = vadd.xlane.f32.xlu0 %v49_v17 }
  0xb0   :  { %98 = vrot.lane.b32.xlu0 %v3873_v3, %s3877_s10 }
 0x123   :  { %v51_v20 = vpop.xlane.xlu0 %50 }
 0x124   :  { %v54_v21 = vsub.f32 %v51_v20, %v53_v19 }
 0x126   :  { %v55_v22 = vmul.f32 0.00390625, %v54_v21  ;;  %v3579_v21 = vld [vmem:[%s4464_s2 + $0x20] sm:$0xff] }
 0x127   :  { %v99_v50 = vpop.permute.xlu0 %98 }
 0x128   :  { %v56_v23 = vmax.f32 %v55_v22, 0.0 }
 0x12a   :  { %v57_v24 = vadd.f32 1e-05, %v56_v23 }
 0x12c   :  { %3865 = vrsqrt.f32 %v57_v24  ;;  %v3582_v24 = vld [vmem:[%s4464_s2 + $0x28] sm:$0xff] }
 0x139   :  { %v3866_v31 = vpop.eup %3865 }
 0x13a   :  { %v59_v35 = vmul.f32 %v3866_v31, %v41_v9  ;;  %v60_v36 = vmul.f32 %v3866_v31, %v42_v10  ;;  %v61_v37 = vmul.f32 %v3866_v31, %v43_v11  ;;  %v3573_v9 = vld [vmem:[%s4464_s2 + $0x10] sm:$0xff] }
 0x13c   :  { %v62_v38 = vmax.f32 %v59_v35, 0.0  ;;  %v63_v39 = vmax.f32 %v60_v36, 0.0  ;;  %v64_v40 = vmax.f32 %v61_v37, 0.0  ;;  %v3588_v36 = vld [vmem:[%s4464_s2 + $0x38] sm:$0xff] }
 0x13e   :  { %v3957_v41 = vmul.f32 %v3950_v32, %v62_v38  ;;  %v3960_v42 = vmul.f32 %v3952_v33, %v63_v39  ;;  %v83_v43 = vmul.f32 %v3954_v34, %v64_v40  ;;  %v3591_v40 = vld [vmem:[%s4464_s2 + $0x40] sm:$0xff] }
 0x140   :  { %86 = vst.msk [vmem:[#allocation2 + $0x18] sm:$0xff] %vm29_vm0, %v83_v43  ;;  %423 = vrot.lane.b32.xlu0 %v3960_v42, %s3875_s8  ;;  %100 = vrot.lane.b32.xlu1 %v3957_v41, %s3877_s10 }
 0x144   :  { %102 = vrot.lane.b32.xlu1 %v3960_v42, %s3877_s10 }
 0x147   :  { %v3972_v44 = vld [vmem:[#allocation2 + $0x18] sm:$0xff] }
 0x148   :  { %425 = vrot.lane.b32.xlu0 %v3972_v44, %s3875_s8  ;;  %104 = vrot.lane.b32.xlu1 %v3972_v44, %s3877_s10 }
 0x14c   :  { %587 = vrot.lane.b32.xlu0 %v3960_v42, %s3876_s9  ;;  %260 = vrot.lane.b32.xlu1 %v3957_v41, %s3874_s30 }
 0x150   :  { %589 = vrot.lane.b32.xlu0 %v3972_v44, %s3876_s9  ;;  %262 = vrot.lane.b32.xlu1 %v3960_v42, %s3874_s30 }
 0x154   :  { %900 = vrot.lane.b32.xlu0 %v3972_v44, %s3879_s1  ;;  %264 = vrot.lane.b32.xlu1 %v3972_v44, %s3874_s30 }
 0x158   :  { %1059 = vrot.lane.b32.xlu0 %v3960_v42, %s3880_s13  ;;  %421 = vrot.lane.b32.xlu1 %v3957_v41, %s3875_s8 }
 0x15c   :  { %1057 = vrot.lane.b32.xlu0 %v3957_v41, %s3880_s13  ;;  %585 = vrot.lane.b32.xlu1 %v3957_v41, %s3876_s9 }
 0x160   :  { %1222 = vrot.lane.b32.xlu0 %v3972_v44, %s3881_s14  ;;  %898 = vrot.lane.b32.xlu1 %v3960_v42, %s3879_s1 }
 0x164   :  { %1381 = vrot.lane.b32.xlu0 %v3960_v42, %s3882_s15  ;;  %896 = vrot.lane.b32.xlu1 %v3957_v41, %s3879_s1 }
 0x168   :  { %1379 = vrot.lane.b32.xlu0 %v3957_v41, %s3882_s15  ;;  %1061 = vrot.lane.b32.xlu1 %v3972_v44, %s3880_s13 }
 0x16c   :  { %1220 = vrot.lane.b32.xlu1 %v3960_v42, %s3881_s14 }
 0x170   :  { %1218 = vrot.lane.b32.xlu1 %v3957_v41, %s3881_s14 }
 0x174   :  { %1383 = vrot.lane.b32.xlu1 %v3972_v44, %s3882_s15 }
 0x178   :  { %1541 = vperm.xlu1 %3863, %v1538_v46  }
 0x1b2   :  { %v101_v51 = vpop.permute.xlu1 %100  ;;  %v424_v52 = vpop.permute.xlu0 %423 }
 0x1b3   :  { %v107_v56 = vsel %vm106_vm3, %v99_v50, %v101_v51 }
 0x1b6   :  { %v103_v53 = vpop.permute.xlu1 %102 }
 0x1b7   :  { %v108_v54 = vsel %vm106_vm3, %v101_v51, %v103_v53 }
 0x1b8   :  { %147 = vmatprep.subr.mxu0 %v108_v54 }
 0x1b9   :  { %148 = vmatpush1.msra.mxu0 %v107_v56 }
 0x1ba   :  { %v426_v57 = vpop.permute.xlu0 %425  ;;  %v105_v58 = vpop.permute.xlu1 %104  ;;  %3746 = vmatprep.subr.mxu0 %v3873_v3  ;;  %3569 = vmatmul.mubr.msk.f32.vlgmr.msra.gmra.mxu0 %vm113_vm4, %v3568_v55 }
 0x1bb   :  { %v109_v59 = vsel %vm106_vm3, %v103_v53, %v105_v58  ;;  %3748 = vmatprep.mubr.msk.f32.mxu0 %vm3878_vm2, %v3873_v3  ;;  %v430_v7 = vsel %vm427_vm6, %v424_v52, %v426_v57 }
 0x1bc   :  { %3747 = vmatpush3.msra.mxu0 %v109_v59 }
 0x1be   :  { %v588_v60 = vpop.permute.xlu0 %587  ;;  %v261_v61 = vpop.permute.xlu1 %260  ;;  %3749 = vmatmul.mubr.msk.f32.vlgmr.msra.gmra.mxu0 %vm113_vm4, %v3568_v55 }
 0x1bf   :  { %340 = vmatprep.mubr.f32.mxu0 %v3873_v3  ;;  %v267_v2 = vsel %vm266_vm5, %v259_v47, %v261_v61 }
 0x1c2   :  { %v590_v62 = vpop.permute.xlu0 %589  ;;  %v263_v63 = vpop.permute.xlu1 %262 }
 0x1c3   :  { %v268_v0 = vsel %vm266_vm5, %v261_v61, %v263_v63  ;;  %v594_v12 = vsel %vm591_vm7, %v588_v60, %v590_v62 }
 0x1c4   :  { %306 = vmatprep.subr.mxu0 %v268_v0 }
 0x1c5   :  { %307 = vmatpush1.msra.mxu0 %v267_v2 }
 0x1c6   :  { %v265_v4 = vpop.permute.xlu1 %264  ;;  %3571 = vmatmul.mubr.msk.f32.vlgmr.msra.gmra.mxu0 %vm113_vm4, %v87_v1  ;;  %v901_v5 = vpop.permute.xlu0 %900 }
 0x1c7   :  { %v269_v6 = vsel %vm266_vm5, %v263_v63, %v265_v4  ;;  %501 = vmatprep.mubr.f32.mxu0 %v3873_v3 }
 0x1c8   :  { %3752 = vmatpush3.msra.mxu1 %v269_v6 }
 0x1c9   :  { %3754 = vmatmul.mubr.msk.f32.vlgmr.msra.gmra.mxu1 %vm113_vm4, %v87_v1  ;;  %3756 = vmatprep.subr.mxu1 %v3873_v3 }
 0x1ca   :  { %v422_v8 = vpop.permute.xlu1 %421  ;;  %3757 = vmatpush3.msra.mxu1 %v430_v7  ;;  %3758 = vmatprep.mubr.msk.f32.mxu1 %vm3878_vm2, %v3873_v3  ;;  %v1060_v13 = vpop.permute.xlu0 %1059 }
 0x1cb   :  { %v428_v10 = vsel %vm427_vm6, %v420_v48, %v422_v8  ;;  %v429_v11 = vsel %vm427_vm6, %v422_v8, %v424_v52  ;;  %3761 = vmatprep.subr.mxu1 %v3873_v3 }
 0x1cc   :  { %467 = vmatprep.subr.mxu0 %v429_v11 }
 0x1cd   :  { %468 = vmatpush1.msra.mxu0 %v428_v10  ;;  %3759 = vmatmul.mubr.msk.f32.vlgmr.msra.gmra.mxu1 %vm113_vm4, %v3573_v9 }
 0x1ce   :  { %3762 = vmatpush3.msra.mxu1 %v594_v12  ;;  %v586_v14 = vpop.permute.xlu1 %585  ;;  %3574 = vmatmul.mubr.msk.f32.vlgmr.msra.gmra.mxu0 %vm113_vm4, %v3573_v9  ;;  %v1058_v19 = vpop.permute.xlu0 %1057 }
 0x1cf   :  { %v592_v16 = vsel %vm591_vm7, %v584_v49, %v586_v14  ;;  %v593_v17 = vsel %vm591_vm7, %v586_v14, %v588_v60  ;;  %3763 = vmatprep.mubr.msk.f32.mxu1 %vm3878_vm2, %v3873_v3  ;;  %3766 = vmatprep.subr.mxu1 %v3873_v3  ;;  %v1064_v29 = vsel %vm1063_vm9, %v1058_v19, %v1060_v13 }
 0x1d0   :  { %631 = vmatprep.subr.mxu0 %v593_v17  ;;  %665 = vmatprep.mubr.f32.mxu0 %v3873_v3 }
 0x1d1   :  { %632 = vmatpush1.msra.mxu0 %v592_v16  ;;  %3764 = vmatmul.mubr.msk.f32.vlgmr.msra.gmra.mxu1 %vm113_vm4, %v3576_v15 }
 0x1d2   :  { %3767 = vmatpush3.msra.mxu1 %v3972_v44  ;;  %v899_v18 = vpop.permute.xlu1 %898  ;;  %3577 = vmatmul.mubr.msk.f32.vlgmr.msra.gmra.mxu0 %vm113_vm4, %v3576_v15  ;;  %v1223_v25 = vpop.permute.xlu0 %1222 }
 0x1d3   :  { %780 = vmatprep.subr.mxu0 %v3960_v42  ;;  %3768 = vmatprep.mubr.msk.f32.mxu1 %vm3878_vm2, %v3873_v3  ;;  %v904_v20 = vsel %vm902_vm8, %v899_v18, %v901_v5 }
 0x1d4   :  { %781 = vmatpush1.msra.mxu0 %v3957_v41  ;;  %3771 = vmatprep.subr.mxu1 %v3873_v3 }
 0x1d5   :  { %941 = vmatprep.subr.mxu0 %v904_v20  ;;  %814 = vmatprep.mubr.f32.mxu0 %v3873_v3 }
 0x1d6   :  { %3769 = vmatmul.mubr.msk.f32.vlgmr.msra.gmra.mxu1 %vm113_vm4, %v3579_v21  ;;  %v897_v22 = vpop.permute.xlu1 %896  ;;  %3580 = vmatmul.mubr.msk.f32.vlgmr.msra.gmra.mxu0 %vm113_vm4, %v3579_v21  ;;  %v1382_v31 = vpop.permute.xlu0 %1381 }
 0x1d7   :  { %3772 = vmatpush3.msra.mxu1 %v901_v5  ;;  %v903_v23 = vsel %vm902_vm8, %v897_v22, %v899_v18  ;;  %3773 = vmatprep.mubr.msk.f32.mxu1 %vm3878_vm2, %v3873_v3 }
 0x1d8   :  { %942 = vmatpush1.msra.mxu0 %v903_v23  ;;  %975 = vmatprep.mubr.f32.mxu0 %v3873_v3 }
 0x1d9   :  { %3776 = vmatprep.subr.mxu1 %v3873_v3 }
 0x1da   :  { %3774 = vmatmul.mubr.msk.f32.vlgmr.msra.gmra.mxu1 %vm113_vm4, %v3582_v24  ;;  %v1062_v26 = vpop.permute.xlu1 %1061  ;;  %3583 = vmatmul.mubr.msk.f32.vlgmr.msra.gmra.mxu0 %vm113_vm4, %v3582_v24  ;;  %v1380_v39 = vpop.permute.xlu0 %1379 }
 0x1db   :  { %3777 = vmatpush3.msra.mxu1 %v1062_v26  ;;  %v1065_v27 = vsel %vm1063_vm9, %v1060_v13, %v1062_v26  ;;  %3778 = vmatprep.mubr.msk.f32.mxu1 %vm3878_vm2, %v3873_v3  ;;  %v1386_v43 = vsel %vm1385_vm11, %v1380_v39, %v1382_v31 }
 0x1dc   :  { %1102 = vmatprep.subr.mxu0 %v1065_v27  ;;  %3781 = vmatprep.subr.mxu1 %v3873_v3 }
 0x1dd   :  { %1103 = vmatpush1.msra.mxu0 %v1064_v29  ;;  %1136 = vmatprep.mubr.f32.mxu0 %v3873_v3 }
 0x1de   :  { %3779 = vmatmul.mubr.msk.f32.vlgmr.msra.gmra.mxu1 %vm113_vm4, %v3585_v28  ;;  %v1221_v30 = vpop.permute.xlu1 %1220  ;;  %3586 = vmatmul.mubr.msk.f32.vlgmr.msra.gmra.mxu0 %vm113_vm4, %v3585_v28 }
 0x1df   :  { %3782 = vmatpush3.msra.mxu1 %v1223_v25  ;;  %v1226_v35 = vsel %vm1224_vm10, %v1221_v30, %v1223_v25  ;;  %3783 = vmatprep.mubr.msk.f32.mxu1 %vm3878_vm2, %v3873_v3 }
 0x1e0   :  { %1263 = vmatprep.subr.mxu0 %v1226_v35  ;;  %1297 = vmatprep.mubr.f32.mxu0 %v3873_v3 }
 0x1e1   :  { %3786 = vmatprep.subr.mxu1 %v3873_v3 }
 0x1e2   :  { %3784 = vmatmul.mubr.msk.f32.vlgmr.msra.gmra.mxu1 %vm113_vm4, %v3588_v36  ;;  %v1219_v37 = vpop.permute.xlu1 %1218 }
 0x1e3   :  { %v1225_v38 = vsel %vm1224_vm10, %v1219_v37, %v1221_v30  ;;  %3788 = vmatprep.mubr.msk.f32.mxu1 %vm3878_vm2, %v3873_v3 }
 0x1e4   :  { %1264 = vmatpush1.msra.mxu0 %v1225_v38 }
 0x1e5   :  { %3589 = vmatmul.mubr.msk.f32.vlgmr.msra.gmra.mxu0 %vm113_vm4, %v3588_v36 }
 0x1e6   :  { %v1384_v41 = vpop.permute.xlu1 %1383  ;;  %1458 = vmatprep.mubr.f32.mxu0 %v3873_v3 }
 0x1e7   :  { %3787 = vmatpush3.msra.mxu1 %v1384_v41  ;;  %v1387_v42 = vsel %vm1385_vm11, %v1382_v31, %v1384_v41 }
 0x1e8   :  { %1424 = vmatprep.subr.mxu0 %v1387_v42  ;;  %3789 = vmatmul.mubr.msk.f32.vlgmr.msra.gmra.mxu1 %vm113_vm4, %v3591_v40 }
 0x1e9   :  { %1425 = vmatpush1.msra.mxu0 %v1386_v43 }
 0x1ea   :  { %3592 = vmatmul.mubr.msk.f32.vlgmr.msra.gmra.mxu0 %vm113_vm4, %v3591_v40 }
 0x1eb   :  { %1683 = vmatprep.mubr.f32.mxu0 %v3873_v3 }
 0x1f3   :  { %v1542_v38 = vpop.permute.xlu1 %1541 }
 0x27a   :  { %v183_v44 = vpop.f32.mrf.mxu0 }
 0x27c   :  { %v185_v45 = vpop.f32.mrf.mxu0 }
 0x27e   :  { %v254_v46 = vpop.f32.mrf.mxu0 }
 0x280   :  { %v3750_v47 = vpop.f32.mrf.mxu0 }
 0x286   :  { %v342_v48 = vpop.f32.mrf.mxu0 }
 0x287   :  { %v343_v6 = vadd.f32 %v342_v48, %v183_v44 }
 0x288   :  { %v344_v51 = vpop.f32.mrf.mxu0 }
 0x289   :  { %v413_v49 = vpop.f32.mrf.mxu1  ;;  %v345_v9 = vadd.f32 %v344_v51, %v185_v45 }
 0x28a   :  { %v414_v0 = vadd.f32 %v413_v49, %v254_v46 }
 0x28b   :  { %v3755_v50 = vpop.f32.mrf.mxu1 }
 0x28d   :  { %v574_v52 = vpop.f32.mrf.mxu1 }
 0x28e   :  { %v503_v53 = vpop.f32.mrf.mxu0  ;;  %v580_v7 = vadd.f32 %v574_v52, %v414_v0 }
 0x28f   :  { %v3760_v54 = vpop.f32.mrf.mxu1  ;;  %v578_v10 = vadd.f32 %v503_v53, %v343_v6 }
 0x290   :  { %v505_v55 = vpop.f32.mrf.mxu0 }
 0x291   :  { %v738_v56 = vpop.f32.mrf.mxu1  ;;  %v579_v14 = vadd.f32 %v505_v55, %v345_v9  ;;  %v3594_v9 = vld [vmem:[%s4465_s4 + $0x10] sm:$0xff] }
 0x292   :  { %v667_v57 = vpop.f32.mrf.mxu0  ;;  %v744_v11 = vadd.f32 %v738_v56, %v580_v7  ;;  %3793 = vmatprep.mubr.msk.f32.mxu1 %vm113_vm4, %v3594_v9 }
 0x293   :  { %v3765_v58 = vpop.f32.mrf.mxu1  ;;  %v742_v15 = vadd.f32 %v667_v57, %v578_v10 }
 0x294   :  { %v669_v59 = vpop.f32.mrf.mxu0 }
 0x295   :  { %v743_v18 = vadd.f32 %v669_v59, %v579_v14 }
 0x296   :  { %v887_v60 = vpop.f32.mrf.mxu1  ;;  %v816_v61 = vpop.f32.mrf.mxu0 }
 0x297   :  { %v893_v16 = vadd.f32 %v887_v60, %v744_v11  ;;  %v891_v19 = vadd.f32 %v816_v61, %v742_v15 }
 0x298   :  { %v3770_v62 = vpop.f32.mrf.mxu1  ;;  %v818_v63 = vpop.f32.mrf.mxu0 }
 0x299   :  { %v892_v23 = vadd.f32 %v818_v63, %v743_v18 }
 0x29a   :  { %v1048_v1 = vpop.f32.mrf.mxu1  ;;  %v977_v2 = vpop.f32.mrf.mxu0 }
 0x29b   :  { %v1054_v20 = vadd.f32 %v1048_v1, %v893_v16  ;;  %v1052_v24 = vadd.f32 %v977_v2, %v891_v19 }
 0x29c   :  { %v3775_v4 = vpop.f32.mrf.mxu1  ;;  %v979_v5 = vpop.f32.mrf.mxu0 }
 0x29d   :  { %v1053_v27 = vadd.f32 %v979_v5, %v892_v23 }
 0x29e   :  { %v1209_v8 = vpop.f32.mrf.mxu1  ;;  %v1138_v12 = vpop.f32.mrf.mxu0 }
 0x29f   :  { %v1215_v25 = vadd.f32 %v1209_v8, %v1054_v20  ;;  %v1213_v28 = vadd.f32 %v1138_v12, %v1052_v24 }
 0x2a0   :  { %v3780_v13 = vpop.f32.mrf.mxu1  ;;  %v1140_v21 = vpop.f32.mrf.mxu0 }
 0x2a1   :  { %v1214_v35 = vadd.f32 %v1140_v21, %v1053_v27  ;;  %v3595_v27 = vld [vmem:[%s4465_s4 + $0x18] sm:$0xff] }
 0x2a2   :  { %v1370_v17 = vpop.f32.mrf.mxu1 }
 0x2a3   :  { %v1376_v29 = vadd.f32 %v1370_v17, %v1215_v25 }
 0x2a4   :  { %v3785_v22 = vpop.f32.mrf.mxu1 }
 0x2a5   :  { %v1299_v26 = vpop.f32.mrf.mxu0 }
 0x2a6   :  { %v1374_v36 = vadd.f32 %v1299_v26, %v1213_v28 }
 0x2a7   :  { %v1301_v30 = vpop.f32.mrf.mxu0 }
 0x2a8   :  { %v1531_v31 = vpop.f32.mrf.mxu1  ;;  %v1375_v41 = vadd.f32 %v1301_v30, %v1214_v35 }
 0x2a9   :  { %v1537_v37 = vadd.f32 %v1531_v31, %v1376_v29 }
 0x2aa   :  { %v1460_v39 = vpop.f32.mrf.mxu0  ;;  %v3790_v40 = vpop.f32.mrf.mxu1 }
 0x2ab   :  { %v1535_v42 = vadd.f32 %v1460_v39, %v1374_v36  ;;  %v1546_v43 = vadd.f32 %v1542_v38, %v1537_v37  ;;  %v1586_v36 = vld [vmem:[%s4465_s4] sm:$0xff]  ;;  %v1587_v40 = vld [vmem:[%s4465_s4 + $0x8] sm:$0xff] }
 0x2ac   :  { %v1462_v44 = vpop.f32.mrf.mxu0  ;;  %v3604_v37 = vld [vmem:[%s4465_s4 + $0x20] sm:$0xff] }
 0x2ad   :  { %v1544_v45 = vadd.f32 %v1542_v38, %v1535_v42  ;;  %v1536_v46 = vadd.f32 %v1462_v44, %v1375_v41  ;;  %v1549_v48 = vmul.f32 %v1546_v43, %v3954_v34 }
 0x2af   :  { %v1545_v47 = vadd.f32 %v1542_v38, %v1536_v46  ;;  %v1547_v49 = vmul.f32 %v1544_v45, %v3950_v32  ;;  %v1551_v52 = vsel %vm29_vm0, %v1549_v48, 0.0 }
 0x2b1   :  { %v1548_v50 = vmul.f32 %v1545_v47, %v3952_v33 }
 0x2b3   :  { %v1550_v51 = vadd.f32 %v1548_v50, %v1547_v49 }
 0x2b5   :  { %v1552_v53 = vadd.f32 %v1551_v52, %v1550_v51 }
 0x2b7   :  { %1553 = vadd.xlane.f32.xlu0 %v1552_v53 }
 0x2cd   :  { %1599 = vrot.lane.b32.xlu0 %v3873_v3, %s3877_s10 }
 0x340   :  { %v1554_v54 = vpop.xlane.xlu0 %1553 }
 0x341   :  { %v1555_v55 = vmul.f32 0.00390625, %v1554_v54  ;;  %v3610_v54 = vld [vmem:[%s4465_s4 + $0x30] sm:$0xff] }
 0x343   :  { %v1556_v56 = vsub.f32 %v1547_v49, %v1555_v55  ;;  %v1557_v57 = vsub.f32 %v1548_v50, %v1555_v55  ;;  %v1558_v58 = vsub.f32 %v1549_v48, %v1555_v55  ;;  %v1567_v1 = vmul.f32 32.0, %v1555_v55  ;;  %v3605_v49 = vld [vmem:[%s4465_s4 + $0x28] sm:$0xff] }
 0x344   :  { %v1600_v20 = vpop.permute.xlu0 %1599 }
 0x345   :  { %v1559_v59 = vmul.f32 %v1556_v56, %v1556_v56  ;;  %v1560_v60 = vmul.f32 %v1557_v57, %v1557_v57  ;;  %v1561_v61 = vmul.f32 %v1558_v58, %v1558_v58  ;;  %v1568_v2 = vmul.f32 %v1567_v1, %v1555_v55 }
 0x347   :  { %v1562_v62 = vadd.f32 %v1560_v60, %v1559_v59  ;;  %v1563_v63 = vsel %vm29_vm0, %v1561_v61, 0.0  ;;  %v3616_v61 = vld [vmem:[%s4465_s4 + $0x40] sm:$0xff] }
 0x349   :  { %v1564_v0 = vadd.f32 %v1563_v63, %v1562_v62  ;;  %v3617_v63 = vld [vmem:[%s4465_s4 + $0x48] sm:$0xff] }
 0x34b   :  { %1565 = vadd.xlane.f32.xlu1 %v1564_v0 }
 0x3d4   :  { %v1566_v4 = vpop.xlane.xlu1 %1565 }
 0x3d5   :  { %v1569_v5 = vsub.f32 %v1566_v4, %v1568_v2 }
 0x3d7   :  { %v1570_v6 = vmul.f32 0.00390625, %v1569_v5  ;;  %v3622_v5 = vld [vmem:[%s4465_s4 + $0x50] sm:$0xff] }
 0x3d9   :  { %v1571_v7 = vmax.f32 %v1570_v6, 0.0 }
 0x3db   :  { %v1572_v8 = vadd.f32 1e-05, %v1571_v7 }
 0x3dd   :  { %3867 = vrsqrt.f32 %v1572_v8  ;;  %v3623_v8 = vld [vmem:[%s4465_s4 + $0x58] sm:$0xff] }
 0x3ea   :  { %v3868_v10 = vpop.eup %3867 }
 0x3eb   :  { %v1574_v11 = vmul.f32 %v3868_v10, %v1556_v56  ;;  %v1575_v12 = vmul.f32 %v3868_v10, %v1557_v57  ;;  %v1576_v13 = vmul.f32 %v3868_v10, %v1558_v58  ;;  %v3611_v58 = vld [vmem:[%s4465_s4 + $0x38] sm:$0xff] }
 0x3ed   :  { %v1577_v14 = vmax.f32 %v1574_v11, 0.0  ;;  %v1578_v15 = vmax.f32 %v1575_v12, 0.0  ;;  %v1579_v16 = vmax.f32 %v1576_v13, 0.0  ;;  %v3628_v12 = vld [vmem:[%s4465_s4 + $0x60] sm:$0xff] }
 0x3ef   :  { %v4132_v17 = vmul.f32 %v1577_v14, %v3950_v32  ;;  %v4135_v18 = vmul.f32 %v1578_v15, %v3952_v33  ;;  %v1582_v19 = vmul.f32 %v1579_v16, %v3954_v34  ;;  %v3352_v33 = vld [vmem:[%s4466_s5 + $0x8] sm:$0xff]  ;;  %v3351_v34 = vld [vmem:[%s4466_s5] sm:$0xff] }
 0x3f0   :  { %v3629_v14 = vld [vmem:[%s4465_s4 + $0x68] sm:$0xff] }
 0x3f1   :  { %1585 = vst.msk [vmem:[#allocation2 + $0x18] sm:$0xff] %vm29_vm0, %v1582_v19  ;;  %1603 = vrot.lane.b32.xlu1 %v4135_v18, %s3877_s10  ;;  %1601 = vrot.lane.b32.xlu0 %v4132_v17, %s3877_s10  ;;  %v3634_v19 = vld [vmem:[%s4465_s4 + $0x70] sm:$0xff] }
 0x3f5   :  { %1771 = vrot.lane.b32.xlu1 %v3873_v3, %s3874_s30  ;;  %1775 = vrot.lane.b32.xlu0 %v4135_v18, %s3874_s30 }
 0x3f8   :  { %v4147_v32 = vld [vmem:[#allocation2 + $0x18] sm:$0xff] }
 0x3f9   :  { %1773 = vrot.lane.b32.xlu1 %v4132_v17, %s3874_s30  ;;  %1605 = vrot.lane.b32.xlu0 %v4147_v32, %s3877_s10 }
 0x3fd   :  { %1946 = vrot.lane.b32.xlu1 %v3873_v3, %s3875_s8  ;;  %1950 = vrot.lane.b32.xlu0 %v4135_v18, %s3875_s8 }
 0x401   :  { %1777 = vrot.lane.b32.xlu1 %v4147_v32, %s3874_s30  ;;  %1948 = vrot.lane.b32.xlu0 %v4132_v17, %s3875_s8 }
 0x405   :  { %1952 = vrot.lane.b32.xlu1 %v4147_v32, %s3875_s8  ;;  %2129 = vrot.lane.b32.xlu0 %v4132_v17, %s3876_s9 }
 0x409   :  { %2131 = vrot.lane.b32.xlu1 %v4135_v18, %s3876_s9  ;;  %2127 = vrot.lane.b32.xlu0 %v3873_v3, %s3876_s9 }
 0x40d   :  { %2133 = vrot.lane.b32.xlu1 %v4147_v32, %s3876_s9  ;;  %2477 = vrot.lane.b32.xlu0 %v4135_v18, %s3879_s1 }
 0x411   :  { %2479 = vrot.lane.b32.xlu1 %v4147_v32, %s3879_s1  ;;  %2475 = vrot.lane.b32.xlu0 %v4132_v17, %s3879_s1 }
 0x415   :  { %2657 = vrot.lane.b32.xlu1 %v4147_v32, %s3880_s13  ;;  %2655 = vrot.lane.b32.xlu0 %v4135_v18, %s3880_s13 }
 0x419   :  { %2653 = vrot.lane.b32.xlu1 %v4132_v17, %s3880_s13  ;;  %2833 = vrot.lane.b32.xlu0 %v4135_v18, %s3881_s14 }
 0x41d   :  { %2835 = vrot.lane.b32.xlu1 %v4147_v32, %s3881_s14  ;;  %2831 = vrot.lane.b32.xlu0 %v4132_v17, %s3881_s14 }
 0x421   :  { %3013 = vrot.lane.b32.xlu1 %v4147_v32, %s3882_s15  ;;  %3011 = vrot.lane.b32.xlu0 %v4135_v18, %s3882_s15 }
 0x425   :  { %3009 = vrot.lane.b32.xlu1 %v4132_v17, %s3882_s15  ;;  %3355 = vperm.xlu0 %3864, %v3351_v34   ;;  %v3869_v34 = vld [vmem:[%s4461_s0 + $0x8] sm:$0xff] }
 0x429   :  { %3360 = vperm.xlu1 %3863, %v3352_v33   ;;  %v3635_v33 = vld [vmem:[%s4465_s4 + $0x78] sm:$0xff] }
 0x463   :  { %v1604_v21 = vpop.permute.xlu1 %1603  ;;  %v1602_v22 = vpop.permute.xlu0 %1601 }
 0x464   :  { %v1607_v23 = vsel %vm106_vm3, %v1600_v20, %v1602_v22  ;;  %v1608_v24 = vsel %vm106_vm3, %v1602_v22, %v1604_v21  ;;  %v3640_v20 = vld [vmem:[%s4465_s4 + $0x80] sm:$0xff]  ;;  %v3641_v22 = vld [vmem:[%s4465_s4 + $0x88] sm:$0xff] }
 0x465   :  { %1649 = vmatprep.subr.mxu0 %v1608_v24  ;;  %v3872_v24 = vld [vmem:[%s4461_s0] sm:$0xff] }
 0x466   :  { %1650 = vmatpush1.msra.mxu0 %v1607_v23  ;;  %v3871_v23 = vld [vmem:[%s4461_s0 + $0x10] sm:$0xff] }
 0x467   :  { %v1772_v25 = vpop.permute.xlu1 %1771  ;;  %3596 = vmatmul.mubr.msk.f32.vlgmr.msra.gmra.mxu0 %vm113_vm4, %v3594_v9  ;;  %v1776_v26 = vpop.permute.xlu0 %1775 }
 0x468   :  { %1689 = vmatprep.mubr.f32.mxu0 %v3873_v3 }
 0x46b   :  { %v1774_v28 = vpop.permute.xlu1 %1773  ;;  %3597 = vmatmul.mubr.msk.f32.gmra.mxu0 %vm113_vm4, %v3595_v27  ;;  %v1606_v29 = vpop.permute.xlu0 %1605 }
 0x46c   :  { %v1779_v30 = vsel %vm266_vm5, %v1772_v25, %v1774_v28  ;;  %v1609_v31 = vsel %vm106_vm3, %v1604_v21, %v1606_v29  ;;  %v1780_v35 = vsel %vm266_vm5, %v1774_v28, %v1776_v26  ;;  %1855 = vmatprep.mubr.f32.mxu0 %v3873_v3  ;;  %v3646_v25 = vld [vmem:[%s4465_s4 + $0x90] sm:$0xff]  ;;  %v3384_v28 = vld [vmem:[%s4467_s6 + $0x78] sm:$0xff] }
 0x46d   :  { %3791 = vmatprep.subr.mxu1 %v1609_v31  ;;  %1821 = vmatprep.subr.mxu0 %v1780_v35  ;;  %v3399_v29 = vld [vmem:[%s4467_s6 + $0xf0] sm:$0xff]  ;;  %v3382_v35 = vld [vmem:[%s4467_s6 + $0x68] sm:$0xff] }
 0x46e   :  { %3792 = vmatpush3.msra.mxu1 %v1609_v31  ;;  %1822 = vmatpush1.msra.mxu0 %v1779_v30  ;;  %v3383_v30 = vld [vmem:[%s4467_s6 + $0x70] sm:$0xff]  ;;  %v3398_v31 = vld [vmem:[%s4467_s6 + $0xe8] sm:$0xff] }
 0x46f   :  { %v1947_v38 = vpop.permute.xlu1 %1946  ;;  %3600 = vmatmul.mubr.msk.f32.vlgmr.msra.gmra.mxu0 %vm113_vm4, %v1586_v36  ;;  %v1951_v39 = vpop.permute.xlu0 %1950  ;;  %3794 = vmatmul.mubr.msk.f32.vlgmr.msra.gmra.mxu1 %vm113_vm4, %v3595_v27  ;;  %v3400_v27 = vld [vmem:[%s4467_s6 + $0xf8] sm:$0xff] }
 0x470   :  { %1861 = vmatprep.mubr.f32.mxu0 %v3873_v3  ;;  %3803 = vmatprep.mubr.msk.f32.mxu1 %vm113_vm4, %v3604_v37 }
 0x473   :  { %v1778_v41 = vpop.permute.xlu1 %1777  ;;  %3601 = vmatmul.mubr.msk.f32.gmra.mxu0 %vm113_vm4, %v1587_v40  ;;  %v1949_v42 = vpop.permute.xlu0 %1948 }
 0x474   :  { %v1781_v43 = vsel %vm266_vm5, %v1776_v26, %v1778_v41  ;;  %3798 = vmatprep.mubr.msk.f32.mxu0 %vm113_vm4, %v1586_v36  ;;  %v1955_v44 = vsel %vm427_vm6, %v1949_v42, %v1951_v39  ;;  %v1954_v45 = vsel %vm427_vm6, %v1947_v38, %v1949_v42  ;;  %v3647_v26 = vld [vmem:[%s4465_s4 + $0x98] sm:$0xff]  ;;  %v3397_v36 = vld [vmem:[%s4467_s6 + $0xe0] sm:$0xff]  ;;  %v3379_v41 = vld [vmem:[%s4467_s6 + $0x50] sm:$0xff] }
 0x475   :  { %3796 = vmatprep.subr.mxu0 %v1781_v43  ;;  %v3396_v38 = vld [vmem:[%s4467_s6 + $0xd8] sm:$0xff]  ;;  %v3394_v42 = vld [vmem:[%s4467_s6 + $0xc8] sm:$0xff] }
 0x476   :  { %3797 = vmatpush3.msra.mxu0 %v1781_v43  ;;  %v3378_v43 = vld [vmem:[%s4467_s6 + $0x48] sm:$0xff] }
 0x477   :  { %v1953_v46 = vpop.permute.xlu1 %1952  ;;  %3799 = vmatmul.mubr.msk.f32.vlgmr.msra.gmra.mxu0 %vm113_vm4, %v1587_v40  ;;  %1996 = vmatprep.subr.mxu0 %v1955_v44  ;;  %v2130_v47 = vpop.permute.xlu0 %2129  ;;  %v3395_v40 = vld [vmem:[%s4467_s6 + $0xd0] sm:$0xff]  ;;  %v3393_v44 = vld [vmem:[%s4467_s6 + $0xc0] sm:$0xff] }
 0x478   :  { %1997 = vmatpush1.msra.mxu0 %v1954_v45  ;;  %v1956_v48 = vsel %vm427_vm6, %v1951_v39, %v1953_v46  ;;  %2030 = vmatprep.mubr.f32.mxu0 %v3873_v3  ;;  %v3380_v39 = vld [vmem:[%s4467_s6 + $0x58] sm:$0xff]  ;;  %v3377_v45 = vld [vmem:[%s4467_s6 + $0x40] sm:$0xff] }
 0x479   :  { %3801 = vmatprep.subr.mxu1 %v1956_v48  ;;  %v3392_v46 = vld [vmem:[%s4467_s6 + $0xb8] sm:$0xff] }
 0x47a   :  { %3802 = vmatpush3.msra.mxu1 %v1956_v48  ;;  %v3391_v48 = vld [vmem:[%s4467_s6 + $0xb0] sm:$0xff] }
 0x47b   :  { %v2132_v50 = vpop.permute.xlu1 %2131  ;;  %3606 = vmatmul.mubr.msk.f32.vlgmr.msra.gmra.mxu0 %vm113_vm4, %v3604_v37  ;;  %3804 = vmatmul.mubr.msk.f32.vlgmr.msra.gmra.mxu1 %vm113_vm4, %v3605_v49  ;;  %v2128_v51 = vpop.permute.xlu0 %2127  ;;  %v3381_v37 = vld [vmem:[%s4467_s6 + $0x60] sm:$0xff] }
 0x47c   :  { %v2135_v52 = vsel %vm591_vm7, %v2128_v51, %v2130_v47  ;;  %v2136_v53 = vsel %vm591_vm7, %v2130_v47, %v2132_v50  ;;  %2036 = vmatprep.mubr.f32.mxu0 %v3873_v3  ;;  %2211 = vmatprep.mubr.f32.mxu1 %v3873_v3  ;;  %v3376_v47 = vld [vmem:[%s4467_s6 + $0x38] sm:$0xff]  ;;  %v3374_v51 = vld [vmem:[%s4467_s6 + $0x28] sm:$0xff] }
 0x47d   :  { %2177 = vmatprep.subr.mxu1 %v2136_v53  ;;  %v3373_v53 = vld [vmem:[%s4467_s6 + $0x20] sm:$0xff] }
 0x47e   :  { %2178 = vmatpush1.msra.mxu1 %v2135_v52  ;;  %v3389_v52 = vld [vmem:[%s4467_s6 + $0xa0] sm:$0xff] }
 0x47f   :  { %v2134_v55 = vpop.permute.xlu1 %2133  ;;  %3607 = vmatmul.mubr.msk.f32.gmra.mxu0 %vm113_vm4, %v3605_v49  ;;  %3612 = vmatmul.mubr.msk.f32.vlgmr.msra.gmra.mxu1 %vm113_vm4, %v3610_v54  ;;  %v2478_v56 = vpop.permute.xlu0 %2477  ;;  %v3375_v49 = vld [vmem:[%s4467_s6 + $0x30] sm:$0xff] }
 0x480   :  { %3811 = vmatprep.subr.mxu1 %v4147_v32  ;;  %v2137_v57 = vsel %vm591_vm7, %v2132_v50, %v2134_v55  ;;  %2217 = vmatprep.mubr.f32.mxu1 %v3873_v3  ;;  %v3390_v50 = vld [vmem:[%s4467_s6 + $0xa8] sm:$0xff]  ;;  %v3372_v55 = vld [vmem:[%s4467_s6 + $0x18] sm:$0xff] }
 0x481   :  { %3812 = vmatpush3.msra.mxu1 %v4147_v32  ;;  %3806 = vmatprep.subr.mxu0 %v2137_v57 }
 0x482   :  { %3807 = vmatpush3.msra.mxu0 %v2137_v57  ;;  %3808 = vmatprep.mubr.msk.f32.mxu0 %vm113_vm4, %v3610_v54  ;;  %v3388_v54 = vld [vmem:[%s4467_s6 + $0x98] sm:$0xff]  ;;  %v3371_v57 = vld [vmem:[%s4467_s6 + $0x10] sm:$0xff] }
 0x483   :  { %v2480_v59 = vpop.permute.xlu1 %2479  ;;  %3613 = vmatmul.mubr.msk.f32.gmra.mxu1 %vm113_vm4, %v3611_v58  ;;  %3809 = vmatmul.mubr.msk.f32.vlgmr.msra.gmra.mxu0 %vm113_vm4, %v3611_v58  ;;  %v2476_v60 = vpop.permute.xlu0 %2475  ;;  %v3386_v58 = vld [vmem:[%s4467_s6 + $0x88] sm:$0xff] }
 0x484   :  { %2344 = vmatprep.subr.mxu0 %v4135_v18  ;;  %v2482_v62 = vsel %vm902_vm8, %v2478_v56, %v2480_v59  ;;  %2378 = vmatprep.mubr.f32.mxu0 %v3873_v3  ;;  %v2481_v0 = vsel %vm902_vm8, %v2476_v60, %v2478_v56  ;;  %v3387_v56 = vld [vmem:[%s4467_s6 + $0x90] sm:$0xff]  ;;  %v3370_v60 = vld [vmem:[%s4467_s6 + $0x8] sm:$0xff] }
 0x485   :  { %2345 = vmatpush1.msra.mxu0 %v4132_v17  ;;  %2522 = vmatprep.subr.mxu1 %v2482_v62  ;;  %v3403_v62 = vld [vmem:[%s4467_s6 + $0x110] sm:$0xff] }
 0x486   :  { %3816 = vmatprep.subr.mxu0 %v2480_v59  ;;  %3813 = vmatprep.mubr.msk.f32.mxu1 %vm113_vm4, %v3616_v61 }
 0x487   :  { %v2658_v1 = vpop.permute.xlu1 %2657  ;;  %3618 = vmatmul.mubr.msk.f32.vlgmr.msra.gmra.mxu0 %vm113_vm4, %v3616_v61  ;;  %3814 = vmatmul.mubr.msk.f32.vlgmr.msra.gmra.mxu1 %vm113_vm4, %v3617_v63  ;;  %v2656_v2 = vpop.permute.xlu0 %2655  ;;  %v3385_v61 = vld [vmem:[%s4467_s6 + $0x80] sm:$0xff] }
 0x488   :  { %2523 = vmatpush1.msra.mxu1 %v2481_v0  ;;  %3817 = vmatpush3.msra.mxu0 %v2480_v59  ;;  %v2660_v4 = vsel %vm1063_vm9, %v2656_v2, %v2658_v1  ;;  %v3404_v59 = vld [vmem:[%s4467_s6 + $0x118] sm:$0xff]  ;;  %v3402_v0 = vld [vmem:[%s4467_s6 + $0x108] sm:$0xff] }
 0x489   :  { %3821 = vmatprep.subr.mxu1 %v2658_v1  ;;  %2700 = vmatprep.subr.mxu0 %v2660_v4 }
 0x48a   :  { %2384 = vmatprep.mubr.f32.mxu0 %v3873_v3  ;;  %2556 = vmatprep.mubr.f32.mxu1 %v3873_v3 }
 0x48b   :  { %v2654_v6 = vpop.permute.xlu1 %2653  ;;  %3619 = vmatmul.mubr.msk.f32.gmra.mxu0 %vm113_vm4, %v3617_v63  ;;  %3624 = vmatmul.mubr.msk.f32.vlgmr.msra.gmra.mxu1 %vm113_vm4, %v3622_v5  ;;  %v2834_v7 = vpop.permute.xlu0 %2833  ;;  %v3369_v63 = vld [vmem:[%s4467_s6] sm:$0xff] }
 0x48c   :  { %3822 = vmatpush3.msra.mxu1 %v2658_v1  ;;  %2562 = vmatprep.mubr.f32.mxu1 %v3873_v3  ;;  %v2659_v9 = vsel %vm1063_vm9, %v2654_v6, %v2656_v2  ;;  %v3401_v1 = vld [vmem:[%s4467_s6 + $0x100] sm:$0xff] }
 0x48d   :  { %3818 = vmatprep.mubr.msk.f32.mxu0 %vm113_vm4, %v3622_v5 }
 0x48f   :  { %v2836_v10 = vpop.permute.xlu1 %2835  ;;  %3625 = vmatmul.mubr.msk.f32.gmra.mxu1 %vm113_vm4, %v3623_v8  ;;  %3819 = vmatmul.mubr.msk.f32.vlgmr.msra.gmra.mxu0 %vm113_vm4, %v3623_v8  ;;  %v2832_v11 = vpop.permute.xlu0 %2831 }
 0x490   :  { %2701 = vmatpush1.msra.mxu0 %v2659_v9  ;;  %v2838_v13 = vsel %vm1224_vm10, %v2834_v7, %v2836_v10  ;;  %2734 = vmatprep.mubr.f32.mxu0 %v3873_v3  ;;  %v2837_v15 = vsel %vm1224_vm10, %v2832_v11, %v2834_v7 }
 0x491   :  { %3826 = vmatprep.subr.mxu0 %v2836_v10  ;;  %2878 = vmatprep.subr.mxu1 %v2838_v13 }
 0x492   :  { %3823 = vmatprep.mubr.msk.f32.mxu1 %vm113_vm4, %v3628_v12 }
 0x493   :  { %v3014_v16 = vpop.permute.xlu1 %3013  ;;  %3630 = vmatmul.mubr.msk.f32.vlgmr.msra.gmra.mxu0 %vm113_vm4, %v3628_v12  ;;  %3824 = vmatmul.mubr.msk.f32.vlgmr.msra.gmra.mxu1 %vm113_vm4, %v3629_v14  ;;  %v3012_v17 = vpop.permute.xlu0 %3011 }
 0x494   :  { %2879 = vmatpush1.msra.mxu1 %v2837_v15  ;;  %3827 = vmatpush3.msra.mxu0 %v2836_v10  ;;  %v3016_v18 = vsel %vm1385_vm11, %v3012_v17, %v3014_v16 }
 0x495   :  { %3831 = vmatprep.subr.mxu1 %v3014_v16  ;;  %3056 = vmatprep.subr.mxu0 %v3016_v18 }
 0x496   :  { %2740 = vmatprep.mubr.f32.mxu0 %v3873_v3  ;;  %2912 = vmatprep.mubr.f32.mxu1 %v3873_v3 }
 0x497   :  { %3631 = vmatmul.mubr.msk.f32.gmra.mxu0 %vm113_vm4, %v3629_v14  ;;  %3636 = vmatmul.mubr.msk.f32.vlgmr.msra.gmra.mxu1 %vm113_vm4, %v3634_v19  ;;  %v3010_v32 = vpop.permute.xlu1 %3009 }
 0x498   :  { %3832 = vmatpush3.msra.mxu1 %v3014_v16  ;;  %2918 = vmatprep.mubr.f32.mxu1 %v3873_v3  ;;  %v3015_v21 = vsel %vm1385_vm11, %v3010_v32, %v3012_v17  ;;  %v3870_v3 = vld [vmem:[#allocation2] sm:$0xff] }
 0x499   :  { %3828 = vmatprep.mubr.msk.f32.mxu0 %vm113_vm4, %v3634_v19  ;;  %3223 = vmatprep.subr.mxu1 %v3869_v34 }
 0x49b   :  { %3637 = vmatmul.mubr.msk.f32.gmra.mxu1 %vm113_vm4, %v3635_v33  ;;  %3829 = vmatmul.mubr.msk.f32.vlgmr.msra.gmra.mxu0 %vm113_vm4, %v3635_v33 }
 0x49c   :  { %3057 = vmatpush1.msra.mxu0 %v3015_v21  ;;  %3090 = vmatprep.mubr.f32.mxu0 %v3870_v3 }
 0x49d   :  { %3833 = vmatprep.mubr.msk.f32.mxu1 %vm113_vm4, %v3640_v20  ;;  %3836 = vmatprep.subr.mxu0 %v3871_v23 }
 0x49f   :  { %3642 = vmatmul.mubr.msk.f32.vlgmr.msra.gmra.mxu0 %vm113_vm4, %v3640_v20  ;;  %3834 = vmatmul.mubr.msk.f32.vlgmr.msra.gmra.mxu1 %vm113_vm4, %v3641_v22 }
 0x4a0   :  { %3096 = vmatprep.mubr.f32.mxu0 %v3870_v3  ;;  %3224 = vmatpush1.msra.mxu1 %v3872_v24 }
 0x4a1   :  { %3257 = vmatprep.mubr.f32.mxu1 %v3870_v3  ;;  %3837 = vmatpush3.msra.mxu0 %v3871_v23 }
 0x4a2   :  { %3702 = vmatprep.subr.mxu1 %v3400_v27  ;;  %3841 = vmatprep.subr.mxu0 %v3404_v59 }
 0x4a3   :  { %3643 = vmatmul.mubr.msk.f32.gmra.mxu0 %vm113_vm4, %v3641_v22  ;;  %3648 = vmatmul.mubr.msk.f32.vlgmr.msra.gmra.mxu1 %vm113_vm4, %v3646_v25 }
 0x4a4   :  { %3263 = vmatprep.mubr.f32.mxu1 %v3870_v3  ;;  %3838 = vmatprep.mubr.msk.f32.mxu0 %vm113_vm4, %v3646_v25 }
 0x4a5   :  { %3703 = vmatpush3.msra.mxu1 %v3384_v28 }
 0x4a6   :  { %3704 = vmatprep.subr.mxu1 %v3399_v29 }
 0x4a7   :  { %3649 = vmatmul.mubr.msk.f32.gmra.mxu1 %vm113_vm4, %v3647_v26  ;;  %3839 = vmatmul.mubr.msk.f32.vlgmr.msra.gmra.mxu0 %vm113_vm4, %v3647_v26 }
 0x4a8   :  { %3705 = vmatpush3.msra.mxu1 %v3383_v30  ;;  %3842 = vmatpush3.msra.mxu0 %v3404_v59 }
 0x4a9   :  { %3706 = vmatprep.subr.mxu1 %v3398_v31  ;;  %3843 = vmatprep.subr.mxu0 %v3403_v62 }
 0x4aa   :  { %3707 = vmatpush3.msra.mxu1 %v3382_v35  ;;  %3844 = vmatpush3.msra.mxu0 %v3403_v62 }
 0x4ab   :  { %3708 = vmatprep.subr.mxu1 %v3397_v36  ;;  %3845 = vmatprep.subr.mxu0 %v3402_v0 }
 0x4ac   :  { %3709 = vmatpush3.msra.mxu1 %v3381_v37  ;;  %3846 = vmatpush3.msra.mxu0 %v3402_v0 }
 0x4ad   :  { %3710 = vmatprep.subr.mxu1 %v3396_v38  ;;  %3847 = vmatprep.subr.mxu0 %v3401_v1 }
 0x4ae   :  { %3711 = vmatpush3.msra.mxu1 %v3380_v39  ;;  %3848 = vmatpush3.msra.mxu0 %v3401_v1 }
 0x4af   :  { %3712 = vmatprep.subr.mxu1 %v3395_v40 }
 0x4b0   :  { %3713 = vmatpush3.msra.mxu1 %v3379_v41 }
 0x4b1   :  { %3714 = vmatprep.subr.mxu1 %v3394_v42 }
 0x4b2   :  { %3715 = vmatpush3.msra.mxu1 %v3378_v43 }
 0x4b3   :  { %3716 = vmatprep.subr.mxu1 %v3393_v44 }
 0x4b4   :  { %3717 = vmatpush3.msra.mxu1 %v3377_v45 }
 0x4b5   :  { %3718 = vmatprep.subr.mxu1 %v3392_v46 }
 0x4b6   :  { %3719 = vmatpush3.msra.mxu1 %v3376_v47 }
 0x4b7   :  { %3720 = vmatprep.subr.mxu1 %v3391_v48 }
 0x4b8   :  { %3721 = vmatpush3.msra.mxu1 %v3375_v49 }
 0x4b9   :  { %3722 = vmatprep.subr.mxu1 %v3390_v50 }
 0x4ba   :  { %3723 = vmatpush3.msra.mxu1 %v3374_v51 }
 0x4bb   :  { %3724 = vmatprep.subr.mxu1 %v3389_v52 }
 0x4bc   :  { %3725 = vmatpush3.msra.mxu1 %v3373_v53 }
 0x4bd   :  { %3726 = vmatprep.subr.mxu1 %v3388_v54 }
 0x4be   :  { %3727 = vmatpush3.msra.mxu1 %v3372_v55 }
 0x4bf   :  { %3728 = vmatprep.subr.mxu1 %v3387_v56 }
 0x4c0   :  { %3729 = vmatpush3.msra.mxu1 %v3371_v57 }
 0x4c1   :  { %3730 = vmatprep.subr.mxu1 %v3386_v58 }
 0x4c2   :  { %3731 = vmatpush3.msra.mxu1 %v3370_v60 }
 0x4c3   :  { %3732 = vmatprep.subr.mxu1 %v3385_v61 }
 0x4c4   :  { %3733 = vmatpush3.msra.mxu1 %v3369_v63 }
 0x527   :  { %v1685_v2 = vpop.f32.mrf.mxu0 }
 0x529   :  { %v1687_v4 = vpop.f32.mrf.mxu0 }
 0x52b   :  { %v1691_v5 = vpop.f32.mrf.mxu0 }
 0x52d   :  { %v1693_v6 = vpop.f32.mrf.mxu0 }
 0x52f   :  { %v1857_v7 = vpop.f32.mrf.mxu0  ;;  %v3795_v11 = vpop.f32.mrf.mxu1 }
 0x530   :  { %v1858_v40 = vadd.f32 %v1857_v7, %v1685_v2 }
 0x531   :  { %v1859_v8 = vpop.f32.mrf.mxu0  ;;  %v1762_v13 = vpop.f32.mrf.mxu1 }
 0x532   :  { %v1860_v43 = vadd.f32 %v1859_v8, %v1687_v4 }
 0x533   :  { %v1863_v9 = vpop.f32.mrf.mxu0 }
 0x534   :  { %v1864_v48 = vadd.f32 %v1863_v9, %v1691_v5 }
 0x535   :  { %v1865_v10 = vpop.f32.mrf.mxu0 }
 0x536   :  { %v1866_v53 = vadd.f32 %v1865_v10, %v1693_v6 }
 0x537   :  { %v3800_v12 = vpop.f32.mrf.mxu0 }
 0x538   :  { %v1940_v49 = vadd.f32 %v3800_v12, %v3795_v11 }
 0x539   :  { %v1934_v14 = vpop.f32.mrf.mxu0 }
 0x53a   :  { %v1935_v54 = vadd.f32 %v1934_v14, %v1762_v13 }
 0x53b   :  { %v2032_v15 = vpop.f32.mrf.mxu0  ;;  %v3805_v16 = vpop.f32.mrf.mxu1 }
 0x53c   :  { %v2118_v44 = vadd.f32 %v2032_v15, %v1858_v40  ;;  %v2123_v56 = vadd.f32 %v3805_v16, %v1940_v49 }
 0x53d   :  { %v2034_v17 = vpop.f32.mrf.mxu0  ;;  %v2109_v18 = vpop.f32.mrf.mxu1 }
 0x53e   :  { %v2119_v47 = vadd.f32 %v2034_v17, %v1860_v43  ;;  %v2120_v61 = vadd.f32 %v2109_v18, %v1935_v54 }
 0x53f   :  { %v2038_v19 = vpop.f32.mrf.mxu0  ;;  %v2213_v32 = vpop.f32.mrf.mxu1 }
 0x540   :  { %v2299_v50 = vadd.f32 %v2213_v32, %v2118_v44  ;;  %v2121_v57 = vadd.f32 %v2038_v19, %v1864_v48  ;;  %v3356_v44 = vpop.permute.xlu0 %3355 }
 0x541   :  { %v2040_v33 = vpop.f32.mrf.mxu0  ;;  %v2215_v34 = vpop.f32.mrf.mxu1 }
 0x542   :  { %v2300_v55 = vadd.f32 %v2215_v34, %v2119_v47  ;;  %v2122_v62 = vadd.f32 %v2040_v33, %v1866_v53 }
 0x543   :  { %v2219_v20 = vpop.f32.mrf.mxu1  ;;  %v3810_v21 = vpop.f32.mrf.mxu0 }
 0x544   :  { %v2302_v0 = vadd.f32 %v2219_v20, %v2121_v57  ;;  %v2304_v1 = vadd.f32 %v3810_v21, %v2123_v56 }
 0x545   :  { %v2221_v3 = vpop.f32.mrf.mxu1  ;;  %v2290_v22 = vpop.f32.mrf.mxu0 }
 0x546   :  { %v2303_v7 = vadd.f32 %v2221_v3, %v2122_v62  ;;  %v2301_v8 = vadd.f32 %v2290_v22, %v2120_v61 }
 0x547   :  { %v2380_v23 = vpop.f32.mrf.mxu0  ;;  %v3815_v24 = vpop.f32.mrf.mxu1 }
 0x548   :  { %v2466_v58 = vadd.f32 %v2380_v23, %v2299_v50  ;;  %v2471_v11 = vadd.f32 %v3815_v24, %v2304_v1 }
 0x549   :  { %v2382_v25 = vpop.f32.mrf.mxu0  ;;  %v2457_v26 = vpop.f32.mrf.mxu1 }
 0x54a   :  { %v2467_v63 = vadd.f32 %v2382_v25, %v2300_v55  ;;  %v2468_v14 = vadd.f32 %v2457_v26, %v2301_v8  ;;  %v3361_v55 = vpop.permute.xlu1 %3360 }
 0x54b   :  { %v2386_v27 = vpop.f32.mrf.mxu0  ;;  %v2558_v28 = vpop.f32.mrf.mxu1 }
 0x54c   :  { %v2644_v2 = vadd.f32 %v2558_v28, %v2466_v58  ;;  %v2469_v6 = vadd.f32 %v2386_v27, %v2302_v0 }
 0x54d   :  { %v2388_v29 = vpop.f32.mrf.mxu0  ;;  %v2560_v30 = vpop.f32.mrf.mxu1 }
 0x54e   :  { %v2645_v9 = vadd.f32 %v2560_v30, %v2467_v63  ;;  %v2470_v15 = vadd.f32 %v2388_v29, %v2303_v7 }
 0x54f   :  { %v2564_v31 = vpop.f32.mrf.mxu1  ;;  %v3820_v35 = vpop.f32.mrf.mxu0 }
 0x550   :  { %v2647_v17 = vadd.f32 %v2564_v31, %v2469_v6  ;;  %v2649_v18 = vadd.f32 %v3820_v35, %v2471_v11 }
 0x551   :  { %v2566_v36 = vpop.f32.mrf.mxu1  ;;  %v2635_v37 = vpop.f32.mrf.mxu0 }
 0x552   :  { %v2648_v34 = vadd.f32 %v2566_v36, %v2470_v15  ;;  %v2646_v20 = vadd.f32 %v2635_v37, %v2468_v14 }
 0x553   :  { %v2736_v38 = vpop.f32.mrf.mxu0  ;;  %v3825_v39 = vpop.f32.mrf.mxu1 }
 0x554   :  { %v2822_v10 = vadd.f32 %v2736_v38, %v2644_v2  ;;  %v2827_v23 = vadd.f32 %v3825_v39, %v2649_v18 }
 0x555   :  { %v2738_v41 = vpop.f32.mrf.mxu0  ;;  %v2813_v42 = vpop.f32.mrf.mxu1 }
 0x556   :  { %v2823_v16 = vadd.f32 %v2738_v41, %v2645_v9  ;;  %v2824_v27 = vadd.f32 %v2813_v42, %v2646_v20 }
 0x557   :  { %v2742_v45 = vpop.f32.mrf.mxu0  ;;  %v2914_v46 = vpop.f32.mrf.mxu1 }
 0x558   :  { %v3000_v19 = vadd.f32 %v2914_v46, %v2822_v10  ;;  %v2825_v3 = vadd.f32 %v2742_v45, %v2647_v17 }
 0x559   :  { %v2744_v51 = vpop.f32.mrf.mxu0  ;;  %v2916_v52 = vpop.f32.mrf.mxu1 }
 0x55a   :  { %v3001_v21 = vadd.f32 %v2916_v52, %v2823_v16  ;;  %v2826_v28 = vadd.f32 %v2744_v51, %v2648_v34 }
 0x55b   :  { %v2920_v59 = vpop.f32.mrf.mxu1  ;;  %v3830_v60 = vpop.f32.mrf.mxu0 }
 0x55c   :  { %v3003_v38 = vadd.f32 %v2920_v59, %v2825_v3  ;;  %v3005_v26 = vadd.f32 %v3830_v60, %v2827_v23 }
 0x55d   :  { %v2922_v4 = vpop.f32.mrf.mxu1  ;;  %v2991_v5 = vpop.f32.mrf.mxu0 }
 0x55e   :  { %v3004_v35 = vadd.f32 %v2922_v4, %v2826_v28  ;;  %v3002_v41 = vadd.f32 %v2991_v5, %v2824_v27 }
 0x55f   :  { %v3092_v12 = vpop.f32.mrf.mxu0  ;;  %v3835_v13 = vpop.f32.mrf.mxu1 }
 0x560   :  { %v3178_v22 = vadd.f32 %v3092_v12, %v3000_v19  ;;  %v3183_v36 = vadd.f32 %v3835_v13, %v3005_v26 }
 0x561   :  { %v3094_v32 = vpop.f32.mrf.mxu0  ;;  %v3169_v33 = vpop.f32.mrf.mxu1 }
 0x562   :  { %v3179_v30 = vadd.f32 %v3094_v32, %v3001_v21  ;;  %v3180_v45 = vadd.f32 %v3169_v33, %v3002_v41 }
 0x563   :  { %v3098_v25 = vpop.f32.mrf.mxu0  ;;  %v3259_v24 = vpop.f32.mrf.mxu1 }
 0x564   :  { %v3345_v29 = vadd.f32 %v3259_v24, %v3178_v22  ;;  %v3181_v37 = vadd.f32 %v3098_v25, %v3003_v38 }
 0x565   :  { %v3100_v40 = vpop.f32.mrf.mxu0  ;;  %v3261_v31 = vpop.f32.mrf.mxu1 }
 0x566   :  { %v3346_v43 = vadd.f32 %v3261_v31, %v3179_v30  ;;  %v3182_v47 = vadd.f32 %v3100_v40, %v3004_v35  ;;  %v3363_v49 = vadd.f32 %v3356_v44, %v3345_v29 }
 0x567   :  { %v3265_v46 = vpop.f32.mrf.mxu1  ;;  %v3840_v39 = vpop.f32.mrf.mxu0 }
 0x568   :  { %v3364_v48 = vadd.f32 %v3356_v44, %v3346_v43  ;;  %v3348_v42 = vadd.f32 %v3265_v46, %v3181_v37  ;;  %v3350_v50 = vadd.f32 %v3840_v39, %v3183_v36 }
 0x569   :  { %v3267_v51 = vpop.f32.mrf.mxu1  ;;  %v3336_v52 = vpop.f32.mrf.mxu0 }
 0x56a   :  { %v3349_v53 = vadd.f32 %v3267_v51, %v3182_v47  ;;  %v3347_v54 = vadd.f32 %v3336_v52, %v3180_v45  ;;  %3475 = vmatprep.mubr.f32.mxu1 %v3364_v48  ;;  %v3366_v58 = vadd.f32 %v3361_v55, %v3348_v42  ;;  %v3368_v59 = vadd.f32 %v3361_v55, %v3350_v50 }
 0x56b   :  { %3476 = vmatmul.mubr.f32.vlgmr.msra.gmra.mxu1 %v3363_v49 }
 0x56c   :  { %v3367_v56 = vadd.f32 %v3361_v55, %v3349_v53  ;;  %v3365_v57 = vadd.f32 %v3356_v44, %v3347_v54 }
 0x56e   :  { %3480 = vmatprep.mubr.f32.mxu1 %v3367_v56  ;;  %3849 = vmatprep.mubr.msk.f32.mxu0 %vm29_vm0, %v3365_v57 }
 0x56f   :  { %3481 = vmatmul.mubr.f32.gmra.mxu1 %v3366_v58  ;;  %3850 = vmatmul.mubr.msk.f32.vlgmr.msra.gmra.mxu0 %vm29_vm0, %v3368_v59 }
 0x62b   :  { %v3734_v60 = vpop.f32.mrf.mxu1 }
 0x62d   :  { %v3735_v61 = vpop.f32.mrf.mxu1 }
 0x62e   :  { %v3736_v0 = vadd.f32 %v3735_v61, %v3734_v60 }
 0x62f   :  { %v3737_v62 = vpop.f32.mrf.mxu1  ;;  %v3851_v63 = vpop.f32.mrf.mxu0 }
 0x631   :  { %v3738_v1 = vpop.f32.mrf.mxu1  ;;  %v3552_v2 = vpop.f32.mrf.mxu0 }
 0x632   :  { %v3739_v4 = vadd.f32 %v3738_v1, %v3737_v62  ;;  %v3553_v5 = vadd.f32 %v3736_v0, %v3552_v2 }
 0x634   :  { %v3558_v7 = vadd.f32 %v3851_v63, %v3739_v4  ;;  %3562 = vst.msk [vmem:[%s4468_s7] sm:$0xff] %vm3561_vm12, %v3553_v5 }
 0x636   :  { %3563 = vst.msk [vmem:[%s4468_s7 + $0x8] sm:$0xff] %vm3561_vm12, %v3558_v7 }

</bundles_post_ra>
